<compile_context>
chip_gen: v6e
topology: v6e:2x2x1
jax: 0.10.0
libtpu: 0.0.40
codegen_flags: <defaults>
</compile_context>

<pallas_src>
import functools

import jax
import jax.numpy as jnp
from jax import lax
from jax.experimental import pallas as pl
from jax.experimental.pallas import tpu as pltpu


# ------------------------------ fused kernel ----------------------------------
def gru4rec_kernel(ids_ref, an_ref, mask_ref, ew_ref, wh_ref, bhn_ref,
                   wfc_ref, bfc_ref, o_ref, gi_ref, *, seq_len, hp, vp):
    """Whole GRU4REC hot path in one kernel invocation.

    ids_ref  : (B, T)  int32 action ids
    an_ref   : (B, 1)  int32 actionNum (step to keep per batch row)
    mask_ref : (B, T)  f32   mask
    ew_ref   : (vp, 3*hp) f32  emb @ W_x + b_x  (gates [r | z | n_in], biases
                               b_ir+b_hr, b_iz+b_hz, b_in folded per vocab row)
    wh_ref   : (hp, 3*hp) f32  recurrent weights [W_hr.T | W_hz.T | W_hn.T]
    bhn_ref  : (1, hp)    f32  b_hn (only bias not foldable into gi)
    wfc_ref  : (hp, Eop)  f32  FC weight (rows >= H and cols >= E are zero)
    bfc_ref  : (1, Eop)   f32  FC bias (padded with zeros)
    o_ref    : (B, Eop)   f32  relu(fc(h[actionNum] * mask[actionNum]))
    gi_ref   : (T, B, 3*hp) f32 VMEM scratch for the hoisted input projection
    """
    B = ids_ref.shape[0]
    T = seq_len
    G = 3 * hp

    # ---- setup (parallel work, off the serial path) ---------------------------
    # Fused embedding lookup + input projection: gi[t*B+b] = emb[ids[b,t]]@W_x+b_x
    # realized as ONE one-hot matmul on the MXU (each one-hot row has exactly one
    # 1.0, so the selection is exact).
    ids = ids_ref[...]                                           # (B, T) int32
    ids_tb = jnp.concatenate([ids[:, t:t + 1] for t in range(T)],
                             axis=0)                             # (T*B, 1) t-major
    onehot = (ids_tb == lax.broadcasted_iota(jnp.int32, (T * B, vp), 1)
              ).astype(jnp.float32)                              # (T*B, vp)
    gi_all = jnp.dot(onehot, ew_ref[...],
                     preferred_element_type=jnp.float32)         # (T*B, 3*hp)
    for t in range(T):                                           # fill (T,B,3*hp)
        gi_ref[t] = gi_all[t * B:(t + 1) * B, :]

    # ---- serial recurrence ----------------------------------------------------
    an = an_ref[...]                                             # (B, 1) int32
    bhn = jnp.broadcast_to(bhn_ref[...], (B, hp))                # hoisted (no CSE)
    h0 = jnp.zeros((B, hp), jnp.float32)

    def step(t, carry):
        h, h_sel = carry
        gi_t = gi_ref[t]                                         # (B, 3*hp)
        gh = jnp.dot(h, wh_ref[...], preferred_element_type=jnp.float32)
        r = jax.nn.sigmoid(gi_t[:, 0:hp] + gh[:, 0:hp])
        z = jax.nn.sigmoid(gi_t[:, hp:2 * hp] + gh[:, hp:2 * hp])
        n = jnp.tanh(gi_t[:, 2 * hp:G] + r * (gh[:, 2 * hp:G] + bhn))
        h_new = (1.0 - z) * n + z * h
        # keep the GRU output at t == actionNum[b]; stays 0 if actionNum is
        # outside [0, T) (caller guarantees it is not).
        h_sel = jnp.where(an == t, h_new, h_sel)
        return h_new, h_sel

    _, h_sel = lax.fori_loop(0, T, step, (h0, h0), unroll=True)

    # ---- epilogue: mask at selected step, FC, ReLU ----------------------------
    tcols = lax.broadcasted_iota(jnp.int32, (B, T), 1)
    m_sel = jnp.sum(jnp.where(tcols == an, mask_ref[...], 0.0),
                    axis=1, keepdims=True)                       # (B, 1)
    h_out = h_sel * m_sel
    y = jnp.dot(h_out, wfc_ref[...],
                preferred_element_type=jnp.float32) + bfc_ref[...]
    o_ref[...] = jnp.maximum(y, 0.0)                             # full-lane store


# --------------------------- parameter packing --------------------------------
def pack_params(raw):
    """Fuse + lane-pad PyTorch-layout GRU/FC/embedding params for the kernel."""
    H = raw["w_hh"].shape[1]
    E = raw["w_ih"].shape[1]
    E_out = raw["w_fc"].shape[0]
    V = raw["embedding"].shape[0]
    hp = ((H + 127) // 128) * 128       # per-gate lane width (>= 128)
    e_pad = ((E_out + 127) // 128) * 128
    vp = ((V + 7) // 8) * 8             # vocab rows padded to sublane multiple

    W_ir, W_iz, W_in = raw["w_ih"][:H], raw["w_ih"][H:2 * H], raw["w_ih"][2 * H:]
    W_hr, W_hz, W_hn = raw["w_hh"][:H], raw["w_hh"][H:2 * H], raw["w_hh"][2 * H:]
    b_ir, b_iz, b_in = raw["b_ih"][:H], raw["b_ih"][H:2 * H], raw["b_ih"][2 * H:]
    b_hr, b_hz, b_hn = raw["b_hh"][:H], raw["b_hh"][H:2 * H], raw["b_hh"][2 * H:]

    def xgate(w, b):
        wc = jnp.zeros((E, hp), jnp.float32).at[:, :H].set(w.T)
        bc = jnp.zeros((hp,), jnp.float32).at[:H].set(b)
        return wc, bc

    wx_r, bx_r = xgate(W_ir, b_ir + b_hr)          # both r biases fold into gi
    wx_z, bx_z = xgate(W_iz, b_iz + b_hz)          # both z biases fold into gi
    wx_n, bx_n = xgate(W_in, b_in)                 # b_hn must stay with gh_n
    w_x = jnp.concatenate([wx_r, wx_z, wx_n], axis=1)            # (E, 3*hp)
    b_x = jnp.concatenate([bx_r, bx_z, bx_n])[None, :]           # (1, 3*hp)

    # Fold the embedding table into the input projection: the in-kernel one-hot
    # matmul then performs lookup + projection in one shot.
    emb_wx = raw["embedding"].astype(jnp.float32) @ w_x + b_x    # (V, 3*hp)
    emb_wx = jnp.pad(emb_wx, ((0, vp - V), (0, 0)))              # (vp, 3*hp)

    # Recurrent weights, one 128-lane tile per gate. Padded rows/cols are zero
    # and b_hn padding is zero, so padded hidden lanes stay exactly 0 every step
    # (r_pad = z_pad = 0.5, n_pad = 0 -> h_pad = 0); wfc padded rows are zero so
    # the output is safe regardless.
    def hgate(w):
        return jnp.zeros((hp, hp), jnp.float32).at[:H, :H].set(w.T)

    w_h = jnp.concatenate([hgate(W_hr), hgate(W_hz), hgate(W_hn)], axis=1)
    b_hn_p = jnp.zeros((1, hp), jnp.float32).at[0, :H].set(b_hn)

    w_fc = jnp.zeros((hp, e_pad), jnp.float32).at[:H, :E_out].set(raw["w_fc"].T)
    b_fc = jnp.zeros((1, e_pad), jnp.float32).at[0, :E_out].set(raw["b_fc"])

    return dict(emb_wx=emb_wx, w_h=w_h, b_hn=b_hn_p, w_fc=w_fc, b_fc=b_fc)


# ------------------------------ forward wrapper --------------------------------
def gru4rec_forward(packed, action_short_batch, action_mask_short_batch,
                    actionNum_short_batch, *, embedding_dim):
    ids = action_short_batch.astype(jnp.int32)                   # (B, T)
    an = actionNum_short_batch.astype(jnp.int32)[:, None]        # (B, 1)
    mask = action_mask_short_batch.astype(jnp.float32)           # (B, T)

    B, T = ids.shape
    vp, G = packed["emb_wx"].shape
    hp = G // 3
    e_pad = packed["w_fc"].shape[1]

    kernel = functools.partial(gru4rec_kernel, seq_len=T, hp=hp, vp=vp)
    out_padded = pl.pallas_call(
        kernel,
        out_shape=jax.ShapeDtypeStruct((B, e_pad), jnp.float32),
        in_specs=[pl.BlockSpec(memory_space=pltpu.MemorySpace.VMEM)] * 8,
        out_specs=pl.BlockSpec(memory_space=pltpu.MemorySpace.VMEM),
        scratch_shapes=[pltpu.VMEM((T, B, G), jnp.float32)],
    )(ids, an, mask, packed["emb_wx"], packed["w_h"], packed["b_hn"],
      packed["w_fc"], packed["b_fc"])
    # Kernel stores a lane-dense (B, 128) slab; the real embedding_dim columns
    # are the result (a consumer could also read the padded slab directly).
    return out_padded[:, :embedding_dim]


# ------------------------------ pure-JAX reference -----------------------------
def gru4rec_reference(raw, actions, mask, action_num):
    emb = jnp.take(raw["embedding"], actions, axis=0).astype(jnp.float32)  # (B,T,E)
    B, T, E = emb.shape
    H = raw["w_hh"].shape[1]
    w_ih_t = raw["w_ih"].T            # (E, 3H)
    w_hh_t = raw["w_hh"].T            # (H, 3H)

    def step(h, x_t):
        gi = x_t @ w_ih_t + raw["b_ih"]
        gh = h @ w_hh_t + raw["b_hh"]
        r = jax.nn.sigmoid(gi[:, :H] + gh[:, :H])
        z = jax.nn.sigmoid(gi[:, H:2 * H] + gh[:, H:2 * H])
        n = jnp.tanh(gi[:, 2 * H:] + r * gh[:, 2 * H:])
        h_new = (1.0 - z) * n + z * h
        return h_new, h_new

    h0 = jnp.zeros((B, H), jnp.float32)
    _, outs = jax.lax.scan(step, h0, jnp.transpose(emb, (1, 0, 2)))
    out_bth = jnp.transpose(outs, (1, 0, 2)) * mask.astype(jnp.float32)[:, :, None]
    seq = out_bth[jnp.arange(B), action_num, :]
    y = seq @ raw["w_fc"].T + raw["b_fc"]
    return jnp.maximum(y, 0.0)


# ------------------------------------ main --------------------------------------
if __name__ == "__main__":
    # small shapes implied by the module
    B, T = 8, 8            # batch, sequence length
    V = 50                 # input_size (vocab)
    E = 32                 # embedding_dim
    H = 64                 # hidden_size (!= E so the fc path is exercised)

    key = jax.random.PRNGKey(0)
    ks = jax.random.split(key, 10)
    s = 1.0 / jnp.sqrt(H)

    # raw params in PyTorch layout (gate order r, z, n)
    raw = {
        "embedding": jax.random.normal(ks[0], (V, E), jnp.float32) * 0.1,
        "w_ih": jax.random.uniform(ks[1], (3 * H, E), jnp.float32, -s, s),
        "w_hh": jax.random.uniform(ks[2], (3 * H, H), jnp.float32, -s, s),
        "b_ih": jax.random.uniform(ks[3], (3 * H,), jnp.float32, -s, s),
        "b_hh": jax.random.uniform(ks[4], (3 * H,), jnp.float32, -s, s),
        "w_fc": jax.random.uniform(ks[5], (E, H), jnp.float32, -s, s),
        "b_fc": jax.random.uniform(ks[6], (E,), jnp.float32, -s, s),
    }
    packed = pack_params(raw)

    action_short_batch = jax.random.randint(ks[7], (B, T), 0, V, jnp.int32)
    lens = jax.random.randint(ks[8], (B,), 1, T + 1, jnp.int32)
    action_mask_short_batch = (jnp.arange(T)[None, :] < lens[:, None]).astype(jnp.float32)
    actionNum_short_batch = (lens - 1).astype(jnp.int32)   # last valid step index

    fwd = jax.jit(functools.partial(gru4rec_forward, embedding_dim=E))
    out = fwd(packed, action_short_batch, action_mask_short_batch,
              actionNum_short_batch)
    out = jax.block_until_ready(out)

    ref = gru4rec_reference(raw, action_short_batch,
                            action_mask_short_batch, actionNum_short_batch)
    assert out.shape == (B, E)
    assert jnp.allclose(out, ref, atol=1e-4, rtol=1e-4), "mismatch vs reference"

    print("KERNEL_OK")
</pallas_src>

<mosaic_0001>
module attributes {stable_mosaic.version = 11 : i64} {
  func.func @gru4rec_kernel(%arg0: memref<8x8xi32, #tpu.memory_space<vmem>>, %arg1: memref<8x1xi32, #tpu.memory_space<vmem>>, %arg2: memref<8x8xf32, #tpu.memory_space<vmem>>, %arg3: memref<56x384xf32, #tpu.memory_space<vmem>>, %arg4: memref<128x384xf32, #tpu.memory_space<vmem>>, %arg5: memref<1x128xf32, #tpu.memory_space<vmem>>, %arg6: memref<128x128xf32, #tpu.memory_space<vmem>>, %arg7: memref<1x128xf32, #tpu.memory_space<vmem>>, %arg8: memref<8x128xf32, #tpu.memory_space<vmem>>, %arg9: memref<8x8x384xf32, #tpu.memory_space<vmem>>) attributes {dimension_semantics = [], scalar_prefetch = 0 : i64, scratch_operands = 1 : i64, tpu.core_type = #tpu.core_type<tc>} {
    %c0 = arith.constant 0 : index
    %c0_0 = arith.constant 0 : index
    %0 = vector.load %arg0[%c0, %c0_0] : memref<8x8xi32, #tpu.memory_space<vmem>>, vector<8x8xi32>
    %1 = vector.extract_strided_slice %0 {offsets = [0, 0], sizes = [8, 1], strides = [1, 1]} : vector<8x8xi32> to vector<8x1xi32>
    %2 = vector.extract_strided_slice %0 {offsets = [0, 1], sizes = [8, 1], strides = [1, 1]} : vector<8x8xi32> to vector<8x1xi32>
    %3 = vector.extract_strided_slice %0 {offsets = [0, 2], sizes = [8, 1], strides = [1, 1]} : vector<8x8xi32> to vector<8x1xi32>
    %4 = vector.extract_strided_slice %0 {offsets = [0, 3], sizes = [8, 1], strides = [1, 1]} : vector<8x8xi32> to vector<8x1xi32>
    %5 = vector.extract_strided_slice %0 {offsets = [0, 4], sizes = [8, 1], strides = [1, 1]} : vector<8x8xi32> to vector<8x1xi32>
    %6 = vector.extract_strided_slice %0 {offsets = [0, 5], sizes = [8, 1], strides = [1, 1]} : vector<8x8xi32> to vector<8x1xi32>
    %7 = vector.extract_strided_slice %0 {offsets = [0, 6], sizes = [8, 1], strides = [1, 1]} : vector<8x8xi32> to vector<8x1xi32>
    %8 = vector.extract_strided_slice %0 {offsets = [0, 7], sizes = [8, 1], strides = [1, 1]} : vector<8x8xi32> to vector<8x1xi32>
    %9 = tpu.concatenate %1, %2, %3, %4, %5, %6, %7, %8 in 0 : vector<8x1xi32>, vector<8x1xi32>, vector<8x1xi32>, vector<8x1xi32>, vector<8x1xi32>, vector<8x1xi32>, vector<8x1xi32>, vector<8x1xi32> -> vector<64x1xi32>
    %10 = tpu.iota {dimensions = array<i32: 1>} : vector<64x56xi32>
    %11 = vector.broadcast %9 : vector<64x1xi32> to vector<64x56xi32>
    %12 = arith.cmpi eq, %11, %10 : vector<64x56xi32>
    %13 = arith.extui %12 : vector<64x56xi1> to vector<64x56xi32>
    %14 = arith.sitofp %13 : vector<64x56xi32> to vector<64x56xf32>
    %c0_1 = arith.constant 0 : index
    %c0_2 = arith.constant 0 : index
    %15 = vector.load %arg3[%c0_1, %c0_2] : memref<56x384xf32, #tpu.memory_space<vmem>>, vector<56x384xf32>
    %cst = arith.constant dense<0.000000e+00> : vector<64x384xf32>
    %16 = tpu.matmul %14, %15, %cst {dimension_numbers = #tpu.dot_dimension_numbers<[1], [0], [0], [1], [0, 0, 1, 1], [], []>} : vector<64x56xf32>, vector<56x384xf32>, vector<64x384xf32> -> vector<64x384xf32>
    %17 = vector.extract_strided_slice %16 {offsets = [0, 0], sizes = [8, 384], strides = [1, 1]} : vector<64x384xf32> to vector<8x384xf32>
    %c0_3 = arith.constant 0 : index
    %c0_4 = arith.constant 0 : index
    %c0_5 = arith.constant 0 : index
    %18 = vector.load %arg9[%c0_3, %c0_4, %c0_5] : memref<8x8x384xf32, #tpu.memory_space<vmem>>, vector<1x8x384xf32>
    %19 = vector.shape_cast %18 : vector<1x8x384xf32> to vector<8x384xf32>
    %20 = vector.shape_cast %17 : vector<8x384xf32> to vector<1x8x384xf32>
    tpu.vector_store %arg9[%c0_3, %c0_4, %c0_5], %20 {strides = array<i32>} : memref<8x8x384xf32, #tpu.memory_space<vmem>>, vector<1x8x384xf32>,
    %21 = vector.extract_strided_slice %16 {offsets = [8, 0], sizes = [8, 384], strides = [1, 1]} : vector<64x384xf32> to vector<8x384xf32>
    %c1 = arith.constant 1 : index
    %c0_6 = arith.constant 0 : index
    %c0_7 = arith.constant 0 : index
    %22 = vector.load %arg9[%c1, %c0_6, %c0_7] : memref<8x8x384xf32, #tpu.memory_space<vmem>>, vector<1x8x384xf32>
    %23 = vector.shape_cast %22 : vector<1x8x384xf32> to vector<8x384xf32>
    %24 = vector.shape_cast %21 : vector<8x384xf32> to vector<1x8x384xf32>
    tpu.vector_store %arg9[%c1, %c0_6, %c0_7], %24 {strides = array<i32>} : memref<8x8x384xf32, #tpu.memory_space<vmem>>, vector<1x8x384xf32>,
    %25 = vector.extract_strided_slice %16 {offsets = [16, 0], sizes = [8, 384], strides = [1, 1]} : vector<64x384xf32> to vector<8x384xf32>
    %c2 = arith.constant 2 : index
    %c0_8 = arith.constant 0 : index
    %c0_9 = arith.constant 0 : index
    %26 = vector.load %arg9[%c2, %c0_8, %c0_9] : memref<8x8x384xf32, #tpu.memory_space<vmem>>, vector<1x8x384xf32>
    %27 = vector.shape_cast %26 : vector<1x8x384xf32> to vector<8x384xf32>
    %28 = vector.shape_cast %25 : vector<8x384xf32> to vector<1x8x384xf32>
    tpu.vector_store %arg9[%c2, %c0_8, %c0_9], %28 {strides = array<i32>} : memref<8x8x384xf32, #tpu.memory_space<vmem>>, vector<1x8x384xf32>,
    %29 = vector.extract_strided_slice %16 {offsets = [24, 0], sizes = [8, 384], strides = [1, 1]} : vector<64x384xf32> to vector<8x384xf32>
    %c3 = arith.constant 3 : index
    %c0_10 = arith.constant 0 : index
    %c0_11 = arith.constant 0 : index
    %30 = vector.load %arg9[%c3, %c0_10, %c0_11] : memref<8x8x384xf32, #tpu.memory_space<vmem>>, vector<1x8x384xf32>
    %31 = vector.shape_cast %30 : vector<1x8x384xf32> to vector<8x384xf32>
    %32 = vector.shape_cast %29 : vector<8x384xf32> to vector<1x8x384xf32>
    tpu.vector_store %arg9[%c3, %c0_10, %c0_11], %32 {strides = array<i32>} : memref<8x8x384xf32, #tpu.memory_space<vmem>>, vector<1x8x384xf32>,
    %33 = vector.extract_strided_slice %16 {offsets = [32, 0], sizes = [8, 384], strides = [1, 1]} : vector<64x384xf32> to vector<8x384xf32>
    %c4 = arith.constant 4 : index
    %c0_12 = arith.constant 0 : index
    %c0_13 = arith.constant 0 : index
    %34 = vector.load %arg9[%c4, %c0_12, %c0_13] : memref<8x8x384xf32, #tpu.memory_space<vmem>>, vector<1x8x384xf32>
    %35 = vector.shape_cast %34 : vector<1x8x384xf32> to vector<8x384xf32>
    %36 = vector.shape_cast %33 : vector<8x384xf32> to vector<1x8x384xf32>
    tpu.vector_store %arg9[%c4, %c0_12, %c0_13], %36 {strides = array<i32>} : memref<8x8x384xf32, #tpu.memory_space<vmem>>, vector<1x8x384xf32>,
    %37 = vector.extract_strided_slice %16 {offsets = [40, 0], sizes = [8, 384], strides = [1, 1]} : vector<64x384xf32> to vector<8x384xf32>
    %c5 = arith.constant 5 : index
    %c0_14 = arith.constant 0 : index
    %c0_15 = arith.constant 0 : index
    %38 = vector.load %arg9[%c5, %c0_14, %c0_15] : memref<8x8x384xf32, #tpu.memory_space<vmem>>, vector<1x8x384xf32>
    %39 = vector.shape_cast %38 : vector<1x8x384xf32> to vector<8x384xf32>
    %40 = vector.shape_cast %37 : vector<8x384xf32> to vector<1x8x384xf32>
    tpu.vector_store %arg9[%c5, %c0_14, %c0_15], %40 {strides = array<i32>} : memref<8x8x384xf32, #tpu.memory_space<vmem>>, vector<1x8x384xf32>,
    %41 = vector.extract_strided_slice %16 {offsets = [48, 0], sizes = [8, 384], strides = [1, 1]} : vector<64x384xf32> to vector<8x384xf32>
    %c6 = arith.constant 6 : index
    %c0_16 = arith.constant 0 : index
    %c0_17 = arith.constant 0 : index
    %42 = vector.load %arg9[%c6, %c0_16, %c0_17] : memref<8x8x384xf32, #tpu.memory_space<vmem>>, vector<1x8x384xf32>
    %43 = vector.shape_cast %42 : vector<1x8x384xf32> to vector<8x384xf32>
    %44 = vector.shape_cast %41 : vector<8x384xf32> to vector<1x8x384xf32>
    tpu.vector_store %arg9[%c6, %c0_16, %c0_17], %44 {strides = array<i32>} : memref<8x8x384xf32, #tpu.memory_space<vmem>>, vector<1x8x384xf32>,
    %45 = vector.extract_strided_slice %16 {offsets = [56, 0], sizes = [8, 384], strides = [1, 1]} : vector<64x384xf32> to vector<8x384xf32>
    %c7 = arith.constant 7 : index
    %c0_18 = arith.constant 0 : index
    %c0_19 = arith.constant 0 : index
    %46 = vector.load %arg9[%c7, %c0_18, %c0_19] : memref<8x8x384xf32, #tpu.memory_space<vmem>>, vector<1x8x384xf32>
    %47 = vector.shape_cast %46 : vector<1x8x384xf32> to vector<8x384xf32>
    %48 = vector.shape_cast %45 : vector<8x384xf32> to vector<1x8x384xf32>
    tpu.vector_store %arg9[%c7, %c0_18, %c0_19], %48 {strides = array<i32>} : memref<8x8x384xf32, #tpu.memory_space<vmem>>, vector<1x8x384xf32>,
    %c0_20 = arith.constant 0 : index
    %c0_21 = arith.constant 0 : index
    %49 = vector.load %arg1[%c0_20, %c0_21] : memref<8x1xi32, #tpu.memory_space<vmem>>, vector<8x1xi32>
    %c0_22 = arith.constant 0 : index
    %c0_23 = arith.constant 0 : index
    %50 = vector.load %arg5[%c0_22, %c0_23] : memref<1x128xf32, #tpu.memory_space<vmem>>, vector<1x128xf32>
    %51 = vector.shape_cast %50 : vector<1x128xf32> to vector<1x128xf32>
    %52 = vector.broadcast %51 : vector<1x128xf32> to vector<8x128xf32>
    %cst_24 = arith.constant 0.000000e+00 : f32
    %53 = vector.broadcast %cst_24 : f32 to vector<8x128xf32>
    %c0_i32 = arith.constant 0 : i32
    %54 = arith.index_cast %c0_i32 : i32 to index
    %c0_25 = arith.constant 0 : index
    %c0_26 = arith.constant 0 : index
    %55 = vector.load %arg9[%54, %c0_25, %c0_26] : memref<8x8x384xf32, #tpu.memory_space<vmem>>, vector<1x8x384xf32>
    %56 = vector.shape_cast %55 : vector<1x8x384xf32> to vector<8x384xf32>
    %c0_27 = arith.constant 0 : index
    %c0_28 = arith.constant 0 : index
    %57 = vector.load %arg4[%c0_27, %c0_28] : memref<128x384xf32, #tpu.memory_space<vmem>>, vector<128x384xf32>
    %cst_29 = arith.constant dense<0.000000e+00> : vector<8x384xf32>
    %58 = tpu.matmul %53, %57, %cst_29 {dimension_numbers = #tpu.dot_dimension_numbers<[1], [0], [0], [1], [0, 0, 1, 1], [], []>} : vector<8x128xf32>, vector<128x384xf32>, vector<8x384xf32> -> vector<8x384xf32>
    %59 = vector.extract_strided_slice %56 {offsets = [0, 0], sizes = [8, 128], strides = [1, 1]} : vector<8x384xf32> to vector<8x128xf32>
    %60 = vector.extract_strided_slice %58 {offsets = [0, 0], sizes = [8, 128], strides = [1, 1]} : vector<8x384xf32> to vector<8x128xf32>
    %61 = arith.addf %59, %60 : vector<8x128xf32>
    %62 = arith.negf %61 : vector<8x128xf32>
    %63 = math.exp %62 : vector<8x128xf32>
    %cst_30 = arith.constant 1.000000e+00 : f32
    %64 = vector.broadcast %cst_30 : f32 to vector<8x128xf32>
    %65 = arith.addf %64, %63 : vector<8x128xf32>
    %66 = arith.divf %64, %65 : vector<8x128xf32>
    %67 = vector.extract_strided_slice %56 {offsets = [0, 128], sizes = [8, 128], strides = [1, 1]} : vector<8x384xf32> to vector<8x128xf32>
    %68 = vector.extract_strided_slice %58 {offsets = [0, 128], sizes = [8, 128], strides = [1, 1]} : vector<8x384xf32> to vector<8x128xf32>
    %69 = arith.addf %67, %68 : vector<8x128xf32>
    %70 = arith.negf %69 : vector<8x128xf32>
    %71 = math.exp %70 : vector<8x128xf32>
    %cst_31 = arith.constant 1.000000e+00 : f32
    %72 = vector.broadcast %cst_31 : f32 to vector<8x128xf32>
    %73 = arith.addf %72, %71 : vector<8x128xf32>
    %74 = arith.divf %72, %73 : vector<8x128xf32>
    %75 = vector.extract_strided_slice %56 {offsets = [0, 256], sizes = [8, 128], strides = [1, 1]} : vector<8x384xf32> to vector<8x128xf32>
    %76 = vector.extract_strided_slice %58 {offsets = [0, 256], sizes = [8, 128], strides = [1, 1]} : vector<8x384xf32> to vector<8x128xf32>
    %77 = arith.addf %76, %52 : vector<8x128xf32>
    %78 = arith.mulf %66, %77 : vector<8x128xf32>
    %79 = arith.addf %75, %78 : vector<8x128xf32>
    %80 = math.tanh %79 : vector<8x128xf32>
    %cst_32 = arith.constant 1.000000e+00 : f32
    %81 = vector.broadcast %cst_32 : f32 to vector<8x128xf32>
    %82 = arith.subf %81, %74 : vector<8x128xf32>
    %83 = arith.mulf %82, %80 : vector<8x128xf32>
    %84 = arith.mulf %74, %53 : vector<8x128xf32>
    %85 = arith.addf %83, %84 : vector<8x128xf32>
    %86 = vector.broadcast %c0_i32 : i32 to vector<8x1xi32>
    %87 = arith.cmpi eq, %49, %86 : vector<8x1xi32>
    %88 = vector.shape_cast %87 : vector<8x1xi1> to vector<8x1xi1>
    %89 = vector.broadcast %88 : vector<8x1xi1> to vector<8x128xi1>
    %90 = arith.select %89, %85, %53 : vector<8x128xi1>, vector<8x128xf32>
    %c1_i32 = arith.constant 1 : i32
    %91 = arith.index_cast %c1_i32 : i32 to index
    %c0_33 = arith.constant 0 : index
    %c0_34 = arith.constant 0 : index
    %92 = vector.load %arg9[%91, %c0_33, %c0_34] : memref<8x8x384xf32, #tpu.memory_space<vmem>>, vector<1x8x384xf32>
    %93 = vector.shape_cast %92 : vector<1x8x384xf32> to vector<8x384xf32>
    %c0_35 = arith.constant 0 : index
    %c0_36 = arith.constant 0 : index
    %94 = vector.load %arg4[%c0_35, %c0_36] : memref<128x384xf32, #tpu.memory_space<vmem>>, vector<128x384xf32>
    %cst_37 = arith.constant dense<0.000000e+00> : vector<8x384xf32>
    %95 = tpu.matmul %85, %94, %cst_37 {dimension_numbers = #tpu.dot_dimension_numbers<[1], [0], [0], [1], [0, 0, 1, 1], [], []>} : vector<8x128xf32>, vector<128x384xf32>, vector<8x384xf32> -> vector<8x384xf32>
    %96 = vector.extract_strided_slice %93 {offsets = [0, 0], sizes = [8, 128], strides = [1, 1]} : vector<8x384xf32> to vector<8x128xf32>
    %97 = vector.extract_strided_slice %95 {offsets = [0, 0], sizes = [8, 128], strides = [1, 1]} : vector<8x384xf32> to vector<8x128xf32>
    %98 = arith.addf %96, %97 : vector<8x128xf32>
    %99 = arith.negf %98 : vector<8x128xf32>
    %100 = math.exp %99 : vector<8x128xf32>
    %cst_38 = arith.constant 1.000000e+00 : f32
    %101 = vector.broadcast %cst_38 : f32 to vector<8x128xf32>
    %102 = arith.addf %101, %100 : vector<8x128xf32>
    %103 = arith.divf %101, %102 : vector<8x128xf32>
    %104 = vector.extract_strided_slice %93 {offsets = [0, 128], sizes = [8, 128], strides = [1, 1]} : vector<8x384xf32> to vector<8x128xf32>
    %105 = vector.extract_strided_slice %95 {offsets = [0, 128], sizes = [8, 128], strides = [1, 1]} : vector<8x384xf32> to vector<8x128xf32>
    %106 = arith.addf %104, %105 : vector<8x128xf32>
    %107 = arith.negf %106 : vector<8x128xf32>
    %108 = math.exp %107 : vector<8x128xf32>
    %cst_39 = arith.constant 1.000000e+00 : f32
    %109 = vector.broadcast %cst_39 : f32 to vector<8x128xf32>
    %110 = arith.addf %109, %108 : vector<8x128xf32>
    %111 = arith.divf %109, %110 : vector<8x128xf32>
    %112 = vector.extract_strided_slice %93 {offsets = [0, 256], sizes = [8, 128], strides = [1, 1]} : vector<8x384xf32> to vector<8x128xf32>
    %113 = vector.extract_strided_slice %95 {offsets = [0, 256], sizes = [8, 128], strides = [1, 1]} : vector<8x384xf32> to vector<8x128xf32>
    %114 = arith.addf %113, %52 : vector<8x128xf32>
    %115 = arith.mulf %103, %114 : vector<8x128xf32>
    %116 = arith.addf %112, %115 : vector<8x128xf32>
    %117 = math.tanh %116 : vector<8x128xf32>
    %cst_40 = arith.constant 1.000000e+00 : f32
    %118 = vector.broadcast %cst_40 : f32 to vector<8x128xf32>
    %119 = arith.subf %118, %111 : vector<8x128xf32>
    %120 = arith.mulf %119, %117 : vector<8x128xf32>
    %121 = arith.mulf %111, %85 : vector<8x128xf32>
    %122 = arith.addf %120, %121 : vector<8x128xf32>
    %123 = vector.broadcast %c1_i32 : i32 to vector<8x1xi32>
    %124 = arith.cmpi eq, %49, %123 : vector<8x1xi32>
    %125 = vector.shape_cast %124 : vector<8x1xi1> to vector<8x1xi1>
    %126 = vector.broadcast %125 : vector<8x1xi1> to vector<8x128xi1>
    %127 = arith.select %126, %122, %90 : vector<8x128xi1>, vector<8x128xf32>
    %c2_i32 = arith.constant 2 : i32
    %128 = arith.index_cast %c2_i32 : i32 to index
    %c0_41 = arith.constant 0 : index
    %c0_42 = arith.constant 0 : index
    %129 = vector.load %arg9[%128, %c0_41, %c0_42] : memref<8x8x384xf32, #tpu.memory_space<vmem>>, vector<1x8x384xf32>
    %130 = vector.shape_cast %129 : vector<1x8x384xf32> to vector<8x384xf32>
    %c0_43 = arith.constant 0 : index
    %c0_44 = arith.constant 0 : index
    %131 = vector.load %arg4[%c0_43, %c0_44] : memref<128x384xf32, #tpu.memory_space<vmem>>, vector<128x384xf32>
    %cst_45 = arith.constant dense<0.000000e+00> : vector<8x384xf32>
    %132 = tpu.matmul %122, %131, %cst_45 {dimension_numbers = #tpu.dot_dimension_numbers<[1], [0], [0], [1], [0, 0, 1, 1], [], []>} : vector<8x128xf32>, vector<128x384xf32>, vector<8x384xf32> -> vector<8x384xf32>
    %133 = vector.extract_strided_slice %130 {offsets = [0, 0], sizes = [8, 128], strides = [1, 1]} : vector<8x384xf32> to vector<8x128xf32>
    %134 = vector.extract_strided_slice %132 {offsets = [0, 0], sizes = [8, 128], strides = [1, 1]} : vector<8x384xf32> to vector<8x128xf32>
    %135 = arith.addf %133, %134 : vector<8x128xf32>
    %136 = arith.negf %135 : vector<8x128xf32>
    %137 = math.exp %136 : vector<8x128xf32>
    %cst_46 = arith.constant 1.000000e+00 : f32
    %138 = vector.broadcast %cst_46 : f32 to vector<8x128xf32>
    %139 = arith.addf %138, %137 : vector<8x128xf32>
    %140 = arith.divf %138, %139 : vector<8x128xf32>
    %141 = vector.extract_strided_slice %130 {offsets = [0, 128], sizes = [8, 128], strides = [1, 1]} : vector<8x384xf32> to vector<8x128xf32>
    %142 = vector.extract_strided_slice %132 {offsets = [0, 128], sizes = [8, 128], strides = [1, 1]} : vector<8x384xf32> to vector<8x128xf32>
    %143 = arith.addf %141, %142 : vector<8x128xf32>
    %144 = arith.negf %143 : vector<8x128xf32>
    %145 = math.exp %144 : vector<8x128xf32>
    %cst_47 = arith.constant 1.000000e+00 : f32
    %146 = vector.broadcast %cst_47 : f32 to vector<8x128xf32>
    %147 = arith.addf %146, %145 : vector<8x128xf32>
    %148 = arith.divf %146, %147 : vector<8x128xf32>
    %149 = vector.extract_strided_slice %130 {offsets = [0, 256], sizes = [8, 128], strides = [1, 1]} : vector<8x384xf32> to vector<8x128xf32>
    %150 = vector.extract_strided_slice %132 {offsets = [0, 256], sizes = [8, 128], strides = [1, 1]} : vector<8x384xf32> to vector<8x128xf32>
    %151 = arith.addf %150, %52 : vector<8x128xf32>
    %152 = arith.mulf %140, %151 : vector<8x128xf32>
    %153 = arith.addf %149, %152 : vector<8x128xf32>
    %154 = math.tanh %153 : vector<8x128xf32>
    %cst_48 = arith.constant 1.000000e+00 : f32
    %155 = vector.broadcast %cst_48 : f32 to vector<8x128xf32>
    %156 = arith.subf %155, %148 : vector<8x128xf32>
    %157 = arith.mulf %156, %154 : vector<8x128xf32>
    %158 = arith.mulf %148, %122 : vector<8x128xf32>
    %159 = arith.addf %157, %158 : vector<8x128xf32>
    %160 = vector.broadcast %c2_i32 : i32 to vector<8x1xi32>
    %161 = arith.cmpi eq, %49, %160 : vector<8x1xi32>
    %162 = vector.shape_cast %161 : vector<8x1xi1> to vector<8x1xi1>
    %163 = vector.broadcast %162 : vector<8x1xi1> to vector<8x128xi1>
    %164 = arith.select %163, %159, %127 : vector<8x128xi1>, vector<8x128xf32>
    %c3_i32 = arith.constant 3 : i32
    %165 = arith.index_cast %c3_i32 : i32 to index
    %c0_49 = arith.constant 0 : index
    %c0_50 = arith.constant 0 : index
    %166 = vector.load %arg9[%165, %c0_49, %c0_50] : memref<8x8x384xf32, #tpu.memory_space<vmem>>, vector<1x8x384xf32>
    %167 = vector.shape_cast %166 : vector<1x8x384xf32> to vector<8x384xf32>
    %c0_51 = arith.constant 0 : index
    %c0_52 = arith.constant 0 : index
    %168 = vector.load %arg4[%c0_51, %c0_52] : memref<128x384xf32, #tpu.memory_space<vmem>>, vector<128x384xf32>
    %cst_53 = arith.constant dense<0.000000e+00> : vector<8x384xf32>
    %169 = tpu.matmul %159, %168, %cst_53 {dimension_numbers = #tpu.dot_dimension_numbers<[1], [0], [0], [1], [0, 0, 1, 1], [], []>} : vector<8x128xf32>, vector<128x384xf32>, vector<8x384xf32> -> vector<8x384xf32>
    %170 = vector.extract_strided_slice %167 {offsets = [0, 0], sizes = [8, 128], strides = [1, 1]} : vector<8x384xf32> to vector<8x128xf32>
    %171 = vector.extract_strided_slice %169 {offsets = [0, 0], sizes = [8, 128], strides = [1, 1]} : vector<8x384xf32> to vector<8x128xf32>
    %172 = arith.addf %170, %171 : vector<8x128xf32>
    %173 = arith.negf %172 : vector<8x128xf32>
    %174 = math.exp %173 : vector<8x128xf32>
    %cst_54 = arith.constant 1.000000e+00 : f32
    %175 = vector.broadcast %cst_54 : f32 to vector<8x128xf32>
    %176 = arith.addf %175, %174 : vector<8x128xf32>
    %177 = arith.divf %175, %176 : vector<8x128xf32>
    %178 = vector.extract_strided_slice %167 {offsets = [0, 128], sizes = [8, 128], strides = [1, 1]} : vector<8x384xf32> to vector<8x128xf32>
    %179 = vector.extract_strided_slice %169 {offsets = [0, 128], sizes = [8, 128], strides = [1, 1]} : vector<8x384xf32> to vector<8x128xf32>
    %180 = arith.addf %178, %179 : vector<8x128xf32>
    %181 = arith.negf %180 : vector<8x128xf32>
    %182 = math.exp %181 : vector<8x128xf32>
    %cst_55 = arith.constant 1.000000e+00 : f32
    %183 = vector.broadcast %cst_55 : f32 to vector<8x128xf32>
    %184 = arith.addf %183, %182 : vector<8x128xf32>
    %185 = arith.divf %183, %184 : vector<8x128xf32>
    %186 = vector.extract_strided_slice %167 {offsets = [0, 256], sizes = [8, 128], strides = [1, 1]} : vector<8x384xf32> to vector<8x128xf32>
    %187 = vector.extract_strided_slice %169 {offsets = [0, 256], sizes = [8, 128], strides = [1, 1]} : vector<8x384xf32> to vector<8x128xf32>
    %188 = arith.addf %187, %52 : vector<8x128xf32>
    %189 = arith.mulf %177, %188 : vector<8x128xf32>
    %190 = arith.addf %186, %189 : vector<8x128xf32>
    %191 = math.tanh %190 : vector<8x128xf32>
    %cst_56 = arith.constant 1.000000e+00 : f32
    %192 = vector.broadcast %cst_56 : f32 to vector<8x128xf32>
    %193 = arith.subf %192, %185 : vector<8x128xf32>
    %194 = arith.mulf %193, %191 : vector<8x128xf32>
    %195 = arith.mulf %185, %159 : vector<8x128xf32>
    %196 = arith.addf %194, %195 : vector<8x128xf32>
    %197 = vector.broadcast %c3_i32 : i32 to vector<8x1xi32>
    %198 = arith.cmpi eq, %49, %197 : vector<8x1xi32>
    %199 = vector.shape_cast %198 : vector<8x1xi1> to vector<8x1xi1>
    %200 = vector.broadcast %199 : vector<8x1xi1> to vector<8x128xi1>
    %201 = arith.select %200, %196, %164 : vector<8x128xi1>, vector<8x128xf32>
    %c4_i32 = arith.constant 4 : i32
    %202 = arith.index_cast %c4_i32 : i32 to index
    %c0_57 = arith.constant 0 : index
    %c0_58 = arith.constant 0 : index
    %203 = vector.load %arg9[%202, %c0_57, %c0_58] : memref<8x8x384xf32, #tpu.memory_space<vmem>>, vector<1x8x384xf32>
    %204 = vector.shape_cast %203 : vector<1x8x384xf32> to vector<8x384xf32>
    %c0_59 = arith.constant 0 : index
    %c0_60 = arith.constant 0 : index
    %205 = vector.load %arg4[%c0_59, %c0_60] : memref<128x384xf32, #tpu.memory_space<vmem>>, vector<128x384xf32>
    %cst_61 = arith.constant dense<0.000000e+00> : vector<8x384xf32>
    %206 = tpu.matmul %196, %205, %cst_61 {dimension_numbers = #tpu.dot_dimension_numbers<[1], [0], [0], [1], [0, 0, 1, 1], [], []>} : vector<8x128xf32>, vector<128x384xf32>, vector<8x384xf32> -> vector<8x384xf32>
    %207 = vector.extract_strided_slice %204 {offsets = [0, 0], sizes = [8, 128], strides = [1, 1]} : vector<8x384xf32> to vector<8x128xf32>
    %208 = vector.extract_strided_slice %206 {offsets = [0, 0], sizes = [8, 128], strides = [1, 1]} : vector<8x384xf32> to vector<8x128xf32>
    %209 = arith.addf %207, %208 : vector<8x128xf32>
    %210 = arith.negf %209 : vector<8x128xf32>
    %211 = math.exp %210 : vector<8x128xf32>
    %cst_62 = arith.constant 1.000000e+00 : f32
    %212 = vector.broadcast %cst_62 : f32 to vector<8x128xf32>
    %213 = arith.addf %212, %211 : vector<8x128xf32>
    %214 = arith.divf %212, %213 : vector<8x128xf32>
    %215 = vector.extract_strided_slice %204 {offsets = [0, 128], sizes = [8, 128], strides = [1, 1]} : vector<8x384xf32> to vector<8x128xf32>
    %216 = vector.extract_strided_slice %206 {offsets = [0, 128], sizes = [8, 128], strides = [1, 1]} : vector<8x384xf32> to vector<8x128xf32>
    %217 = arith.addf %215, %216 : vector<8x128xf32>
    %218 = arith.negf %217 : vector<8x128xf32>
    %219 = math.exp %218 : vector<8x128xf32>
    %cst_63 = arith.constant 1.000000e+00 : f32
    %220 = vector.broadcast %cst_63 : f32 to vector<8x128xf32>
    %221 = arith.addf %220, %219 : vector<8x128xf32>
    %222 = arith.divf %220, %221 : vector<8x128xf32>
    %223 = vector.extract_strided_slice %204 {offsets = [0, 256], sizes = [8, 128], strides = [1, 1]} : vector<8x384xf32> to vector<8x128xf32>
    %224 = vector.extract_strided_slice %206 {offsets = [0, 256], sizes = [8, 128], strides = [1, 1]} : vector<8x384xf32> to vector<8x128xf32>
    %225 = arith.addf %224, %52 : vector<8x128xf32>
    %226 = arith.mulf %214, %225 : vector<8x128xf32>
    %227 = arith.addf %223, %226 : vector<8x128xf32>
    %228 = math.tanh %227 : vector<8x128xf32>
    %cst_64 = arith.constant 1.000000e+00 : f32
    %229 = vector.broadcast %cst_64 : f32 to vector<8x128xf32>
    %230 = arith.subf %229, %222 : vector<8x128xf32>
    %231 = arith.mulf %230, %228 : vector<8x128xf32>
    %232 = arith.mulf %222, %196 : vector<8x128xf32>
    %233 = arith.addf %231, %232 : vector<8x128xf32>
    %234 = vector.broadcast %c4_i32 : i32 to vector<8x1xi32>
    %235 = arith.cmpi eq, %49, %234 : vector<8x1xi32>
    %236 = vector.shape_cast %235 : vector<8x1xi1> to vector<8x1xi1>
    %237 = vector.broadcast %236 : vector<8x1xi1> to vector<8x128xi1>
    %238 = arith.select %237, %233, %201 : vector<8x128xi1>, vector<8x128xf32>
    %c5_i32 = arith.constant 5 : i32
    %239 = arith.index_cast %c5_i32 : i32 to index
    %c0_65 = arith.constant 0 : index
    %c0_66 = arith.constant 0 : index
    %240 = vector.load %arg9[%239, %c0_65, %c0_66] : memref<8x8x384xf32, #tpu.memory_space<vmem>>, vector<1x8x384xf32>
    %241 = vector.shape_cast %240 : vector<1x8x384xf32> to vector<8x384xf32>
    %c0_67 = arith.constant 0 : index
    %c0_68 = arith.constant 0 : index
    %242 = vector.load %arg4[%c0_67, %c0_68] : memref<128x384xf32, #tpu.memory_space<vmem>>, vector<128x384xf32>
    %cst_69 = arith.constant dense<0.000000e+00> : vector<8x384xf32>
    %243 = tpu.matmul %233, %242, %cst_69 {dimension_numbers = #tpu.dot_dimension_numbers<[1], [0], [0], [1], [0, 0, 1, 1], [], []>} : vector<8x128xf32>, vector<128x384xf32>, vector<8x384xf32> -> vector<8x384xf32>
    %244 = vector.extract_strided_slice %241 {offsets = [0, 0], sizes = [8, 128], strides = [1, 1]} : vector<8x384xf32> to vector<8x128xf32>
    %245 = vector.extract_strided_slice %243 {offsets = [0, 0], sizes = [8, 128], strides = [1, 1]} : vector<8x384xf32> to vector<8x128xf32>
    %246 = arith.addf %244, %245 : vector<8x128xf32>
    %247 = arith.negf %246 : vector<8x128xf32>
    %248 = math.exp %247 : vector<8x128xf32>
    %cst_70 = arith.constant 1.000000e+00 : f32
    %249 = vector.broadcast %cst_70 : f32 to vector<8x128xf32>
    %250 = arith.addf %249, %248 : vector<8x128xf32>
    %251 = arith.divf %249, %250 : vector<8x128xf32>
    %252 = vector.extract_strided_slice %241 {offsets = [0, 128], sizes = [8, 128], strides = [1, 1]} : vector<8x384xf32> to vector<8x128xf32>
    %253 = vector.extract_strided_slice %243 {offsets = [0, 128], sizes = [8, 128], strides = [1, 1]} : vector<8x384xf32> to vector<8x128xf32>
    %254 = arith.addf %252, %253 : vector<8x128xf32>
    %255 = arith.negf %254 : vector<8x128xf32>
    %256 = math.exp %255 : vector<8x128xf32>
    %cst_71 = arith.constant 1.000000e+00 : f32
    %257 = vector.broadcast %cst_71 : f32 to vector<8x128xf32>
    %258 = arith.addf %257, %256 : vector<8x128xf32>
    %259 = arith.divf %257, %258 : vector<8x128xf32>
    %260 = vector.extract_strided_slice %241 {offsets = [0, 256], sizes = [8, 128], strides = [1, 1]} : vector<8x384xf32> to vector<8x128xf32>
    %261 = vector.extract_strided_slice %243 {offsets = [0, 256], sizes = [8, 128], strides = [1, 1]} : vector<8x384xf32> to vector<8x128xf32>
    %262 = arith.addf %261, %52 : vector<8x128xf32>
    %263 = arith.mulf %251, %262 : vector<8x128xf32>
    %264 = arith.addf %260, %263 : vector<8x128xf32>
    %265 = math.tanh %264 : vector<8x128xf32>
    %cst_72 = arith.constant 1.000000e+00 : f32
    %266 = vector.broadcast %cst_72 : f32 to vector<8x128xf32>
    %267 = arith.subf %266, %259 : vector<8x128xf32>
    %268 = arith.mulf %267, %265 : vector<8x128xf32>
    %269 = arith.mulf %259, %233 : vector<8x128xf32>
    %270 = arith.addf %268, %269 : vector<8x128xf32>
    %271 = vector.broadcast %c5_i32 : i32 to vector<8x1xi32>
    %272 = arith.cmpi eq, %49, %271 : vector<8x1xi32>
    %273 = vector.shape_cast %272 : vector<8x1xi1> to vector<8x1xi1>
    %274 = vector.broadcast %273 : vector<8x1xi1> to vector<8x128xi1>
    %275 = arith.select %274, %270, %238 : vector<8x128xi1>, vector<8x128xf32>
    %c6_i32 = arith.constant 6 : i32
    %276 = arith.index_cast %c6_i32 : i32 to index
    %c0_73 = arith.constant 0 : index
    %c0_74 = arith.constant 0 : index
    %277 = vector.load %arg9[%276, %c0_73, %c0_74] : memref<8x8x384xf32, #tpu.memory_space<vmem>>, vector<1x8x384xf32>
    %278 = vector.shape_cast %277 : vector<1x8x384xf32> to vector<8x384xf32>
    %c0_75 = arith.constant 0 : index
    %c0_76 = arith.constant 0 : index
    %279 = vector.load %arg4[%c0_75, %c0_76] : memref<128x384xf32, #tpu.memory_space<vmem>>, vector<128x384xf32>
    %cst_77 = arith.constant dense<0.000000e+00> : vector<8x384xf32>
    %280 = tpu.matmul %270, %279, %cst_77 {dimension_numbers = #tpu.dot_dimension_numbers<[1], [0], [0], [1], [0, 0, 1, 1], [], []>} : vector<8x128xf32>, vector<128x384xf32>, vector<8x384xf32> -> vector<8x384xf32>
    %281 = vector.extract_strided_slice %278 {offsets = [0, 0], sizes = [8, 128], strides = [1, 1]} : vector<8x384xf32> to vector<8x128xf32>
    %282 = vector.extract_strided_slice %280 {offsets = [0, 0], sizes = [8, 128], strides = [1, 1]} : vector<8x384xf32> to vector<8x128xf32>
    %283 = arith.addf %281, %282 : vector<8x128xf32>
    %284 = arith.negf %283 : vector<8x128xf32>
    %285 = math.exp %284 : vector<8x128xf32>
    %cst_78 = arith.constant 1.000000e+00 : f32
    %286 = vector.broadcast %cst_78 : f32 to vector<8x128xf32>
    %287 = arith.addf %286, %285 : vector<8x128xf32>
    %288 = arith.divf %286, %287 : vector<8x128xf32>
    %289 = vector.extract_strided_slice %278 {offsets = [0, 128], sizes = [8, 128], strides = [1, 1]} : vector<8x384xf32> to vector<8x128xf32>
    %290 = vector.extract_strided_slice %280 {offsets = [0, 128], sizes = [8, 128], strides = [1, 1]} : vector<8x384xf32> to vector<8x128xf32>
    %291 = arith.addf %289, %290 : vector<8x128xf32>
    %292 = arith.negf %291 : vector<8x128xf32>
    %293 = math.exp %292 : vector<8x128xf32>
    %cst_79 = arith.constant 1.000000e+00 : f32
    %294 = vector.broadcast %cst_79 : f32 to vector<8x128xf32>
    %295 = arith.addf %294, %293 : vector<8x128xf32>
    %296 = arith.divf %294, %295 : vector<8x128xf32>
    %297 = vector.extract_strided_slice %278 {offsets = [0, 256], sizes = [8, 128], strides = [1, 1]} : vector<8x384xf32> to vector<8x128xf32>
    %298 = vector.extract_strided_slice %280 {offsets = [0, 256], sizes = [8, 128], strides = [1, 1]} : vector<8x384xf32> to vector<8x128xf32>
    %299 = arith.addf %298, %52 : vector<8x128xf32>
    %300 = arith.mulf %288, %299 : vector<8x128xf32>
    %301 = arith.addf %297, %300 : vector<8x128xf32>
    %302 = math.tanh %301 : vector<8x128xf32>
    %cst_80 = arith.constant 1.000000e+00 : f32
    %303 = vector.broadcast %cst_80 : f32 to vector<8x128xf32>
    %304 = arith.subf %303, %296 : vector<8x128xf32>
    %305 = arith.mulf %304, %302 : vector<8x128xf32>
    %306 = arith.mulf %296, %270 : vector<8x128xf32>
    %307 = arith.addf %305, %306 : vector<8x128xf32>
    %308 = vector.broadcast %c6_i32 : i32 to vector<8x1xi32>
    %309 = arith.cmpi eq, %49, %308 : vector<8x1xi32>
    %310 = vector.shape_cast %309 : vector<8x1xi1> to vector<8x1xi1>
    %311 = vector.broadcast %310 : vector<8x1xi1> to vector<8x128xi1>
    %312 = arith.select %311, %307, %275 : vector<8x128xi1>, vector<8x128xf32>
    %c7_i32 = arith.constant 7 : i32
    %313 = arith.index_cast %c7_i32 : i32 to index
    %c0_81 = arith.constant 0 : index
    %c0_82 = arith.constant 0 : index
    %314 = vector.load %arg9[%313, %c0_81, %c0_82] : memref<8x8x384xf32, #tpu.memory_space<vmem>>, vector<1x8x384xf32>
    %315 = vector.shape_cast %314 : vector<1x8x384xf32> to vector<8x384xf32>
    %c0_83 = arith.constant 0 : index
    %c0_84 = arith.constant 0 : index
    %316 = vector.load %arg4[%c0_83, %c0_84] : memref<128x384xf32, #tpu.memory_space<vmem>>, vector<128x384xf32>
    %cst_85 = arith.constant dense<0.000000e+00> : vector<8x384xf32>
    %317 = tpu.matmul %307, %316, %cst_85 {dimension_numbers = #tpu.dot_dimension_numbers<[1], [0], [0], [1], [0, 0, 1, 1], [], []>} : vector<8x128xf32>, vector<128x384xf32>, vector<8x384xf32> -> vector<8x384xf32>
    %318 = vector.extract_strided_slice %315 {offsets = [0, 0], sizes = [8, 128], strides = [1, 1]} : vector<8x384xf32> to vector<8x128xf32>
    %319 = vector.extract_strided_slice %317 {offsets = [0, 0], sizes = [8, 128], strides = [1, 1]} : vector<8x384xf32> to vector<8x128xf32>
    %320 = arith.addf %318, %319 : vector<8x128xf32>
    %321 = arith.negf %320 : vector<8x128xf32>
    %322 = math.exp %321 : vector<8x128xf32>
    %cst_86 = arith.constant 1.000000e+00 : f32
    %323 = vector.broadcast %cst_86 : f32 to vector<8x128xf32>
    %324 = arith.addf %323, %322 : vector<8x128xf32>
    %325 = arith.divf %323, %324 : vector<8x128xf32>
    %326 = vector.extract_strided_slice %315 {offsets = [0, 128], sizes = [8, 128], strides = [1, 1]} : vector<8x384xf32> to vector<8x128xf32>
    %327 = vector.extract_strided_slice %317 {offsets = [0, 128], sizes = [8, 128], strides = [1, 1]} : vector<8x384xf32> to vector<8x128xf32>
    %328 = arith.addf %326, %327 : vector<8x128xf32>
    %329 = arith.negf %328 : vector<8x128xf32>
    %330 = math.exp %329 : vector<8x128xf32>
    %cst_87 = arith.constant 1.000000e+00 : f32
    %331 = vector.broadcast %cst_87 : f32 to vector<8x128xf32>
    %332 = arith.addf %331, %330 : vector<8x128xf32>
    %333 = arith.divf %331, %332 : vector<8x128xf32>
    %334 = vector.extract_strided_slice %315 {offsets = [0, 256], sizes = [8, 128], strides = [1, 1]} : vector<8x384xf32> to vector<8x128xf32>
    %335 = vector.extract_strided_slice %317 {offsets = [0, 256], sizes = [8, 128], strides = [1, 1]} : vector<8x384xf32> to vector<8x128xf32>
    %336 = arith.addf %335, %52 : vector<8x128xf32>
    %337 = arith.mulf %325, %336 : vector<8x128xf32>
    %338 = arith.addf %334, %337 : vector<8x128xf32>
    %339 = math.tanh %338 : vector<8x128xf32>
    %cst_88 = arith.constant 1.000000e+00 : f32
    %340 = vector.broadcast %cst_88 : f32 to vector<8x128xf32>
    %341 = arith.subf %340, %333 : vector<8x128xf32>
    %342 = arith.mulf %341, %339 : vector<8x128xf32>
    %343 = arith.mulf %333, %307 : vector<8x128xf32>
    %344 = arith.addf %342, %343 : vector<8x128xf32>
    %345 = vector.broadcast %c7_i32 : i32 to vector<8x1xi32>
    %346 = arith.cmpi eq, %49, %345 : vector<8x1xi32>
    %347 = vector.shape_cast %346 : vector<8x1xi1> to vector<8x1xi1>
    %348 = vector.broadcast %347 : vector<8x1xi1> to vector<8x128xi1>
    %349 = arith.select %348, %344, %312 : vector<8x128xi1>, vector<8x128xf32>
    %c8_i32 = arith.constant 8 : i32
    %350 = tpu.iota {dimensions = array<i32: 1>} : vector<8x8xi32>
    %351 = vector.broadcast %49 : vector<8x1xi32> to vector<8x8xi32>
    %352 = arith.cmpi eq, %350, %351 : vector<8x8xi32>
    %c0_89 = arith.constant 0 : index
    %c0_90 = arith.constant 0 : index
    %353 = vector.load %arg2[%c0_89, %c0_90] : memref<8x8xf32, #tpu.memory_space<vmem>>, vector<8x8xf32>
    %cst_91 = arith.constant 0.000000e+00 : f32
    %354 = vector.broadcast %cst_91 : f32 to vector<8x8xf32>
    %355 = arith.select %352, %353, %354 : vector<8x8xi1>, vector<8x8xf32>
    %cst_92 = arith.constant dense<0.000000e+00> : vector<8xf32>
    %356 = vector.multi_reduction <add>, %355, %cst_92 [1] : vector<8x8xf32> to vector<8xf32>
    %357 = vector.shape_cast %356 : vector<8xf32> to vector<8x1xf32>
    %358 = vector.broadcast %357 : vector<8x1xf32> to vector<8x128xf32>
    %359 = arith.mulf %349, %358 : vector<8x128xf32>
    %c0_93 = arith.constant 0 : index
    %c0_94 = arith.constant 0 : index
    %360 = vector.load %arg6[%c0_93, %c0_94] : memref<128x128xf32, #tpu.memory_space<vmem>>, vector<128x128xf32>
    %cst_95 = arith.constant dense<0.000000e+00> : vector<8x128xf32>
    %361 = tpu.matmul %359, %360, %cst_95 {dimension_numbers = #tpu.dot_dimension_numbers<[1], [0], [0], [1], [0, 0, 1, 1], [], []>} : vector<8x128xf32>, vector<128x128xf32>, vector<8x128xf32> -> vector<8x128xf32>
    %c0_96 = arith.constant 0 : index
    %c0_97 = arith.constant 0 : index
    %362 = vector.load %arg7[%c0_96, %c0_97] : memref<1x128xf32, #tpu.memory_space<vmem>>, vector<1x128xf32>
    %363 = vector.broadcast %362 : vector<1x128xf32> to vector<8x128xf32>
    %364 = arith.addf %361, %363 : vector<8x128xf32>
    %cst_98 = arith.constant 0.000000e+00 : f32
    %365 = vector.broadcast %cst_98 : f32 to vector<8x128xf32>
    %366 = arith.maximumf %364, %365 : vector<8x128xf32>
    %c0_99 = arith.constant 0 : index
    %c0_100 = arith.constant 0 : index
    %367 = vector.load %arg8[%c0_99, %c0_100] : memref<8x128xf32, #tpu.memory_space<vmem>>, vector<8x128xf32>
    tpu.vector_store %arg8[%c0_99, %c0_100], %366 {strides = array<i32>} : memref<8x128xf32, #tpu.memory_space<vmem>>, vector<8x128xf32>,
    return
  }
}

</mosaic_0001>

<bundles_post_ra>
// kernel: gru4rec_forward.1
= control target key start
LH: loop header
LB: loop body
LE: loop exit
PB: predicated region body
PF: predicated region fallthrough
CT: control target
= control target key end

     0   :  { %13 = vsyncpa [#allocation4], 0  ;;  %s3868_s0 = inlined_call_operand.vmem [shape: s32[8,8], index: 0, kind: input, shape index: {}]   ;;  %s3869_s1 = inlined_call_operand.vmem [shape: s32[8,1], index: 1, kind: input, shape index: {}]   ;;  %s3870_s2 = inlined_call_operand.vmem [shape: f32[8,8], index: 2, kind: input, shape index: {}]   ;;  %s3871_s3 = inlined_call_operand.hbm [shape: f32[56,384], index: 3, kind: input, shape index: {}]   ;;  %s3872_s4 = inlined_call_operand.hbm [shape: f32[128,384], index: 4, kind: input, shape index: {}]   ;;  %s3873_s5 = inlined_call_operand.hbm [shape: f32[1,128], index: 5, kind: input, shape index: {}]   ;;  %s3874_s6 = inlined_call_operand.hbm [shape: f32[128,128], index: 6, kind: input, shape index: {}]   ;;  %s3875_s7 = inlined_call_operand.hbm [shape: f32[1,128], index: 7, kind: input, shape index: {}]   ;;  %s3876_s8 = inlined_call_operand.hbm [shape: f32[8,128], index: 8, kind: output, shape index: {}]  }
   0x1   :  { %14 = vsyncpa [#allocation7], 0 }
   0x2   :  { %15 = vsyncpa [#allocation10], 0 }
   0x3   :  { %16 = vsyncpa [#allocation5], 0  ;;  %s2847_s27 = smov [#allocation6]   ;;  %s2848_s29 = smov [#allocation9]  }
   0x4   :  { %s40_s28 = sshll.u32 %s2847_s27, 4  ;;  %s62_s30 = sshll.u32 %s2848_s29, 4  ;;  %s41_s28 = int_to_ptr.vmem [resolvable:$true] %s40_s28  ;;  %s63_s30 = int_to_ptr.vmem [resolvable:$true] %s62_s30 }
   0x5   :  { %s2727_s9 = scalar_lea.vmem %s41_s28, 6144  ;;  %p2732_p1 = scmp.lt.s32.totalorder %s41_s28, %s41_s28 }
   0x6   :  { %p2728_p0 = scmp.ne.s32.totalorder %s41_s28, %s2727_s9  ;;  %p2733_p2 = scmp.lt.s32.totalorder %s2727_s9, %s2727_s9 }
   0x8   :  { %p2734_p3 = por %p2733_p2, %p2732_p1 }
   0xa   :  { %p2735_p4 = pnand %p2734_p3, %p2728_p0 }
   0xc   :  { %2738 = shalt.err (!%p2735_p4)
}
   0xd   :  { %s2849_s10 = smov 384   ;;  %s2850_s11 = smov 24  }
   0xe   :  { %46 = dma.hbm_to_vmem [thread:$0]  %s3872_s4, 6144, %s41_s28, [#allocation7], %s2849_s10, %s2849_s10, %s2850_s11  }
   0xf   :  { %s2747_s14 = scalar_lea.vmem %s63_s30, 2048  ;;  %p2752_p6 = scmp.lt.s32.totalorder %s63_s30, %s63_s30 }
  0x10   :  { %p2748_p5 = scmp.ne.s32.totalorder %s63_s30, %s2747_s14  ;;  %p2753_p7 = scmp.lt.s32.totalorder %s2747_s14, %s2747_s14 }
  0x12   :  { %p2754_p8 = por %p2753_p7, %p2752_p6 }
  0x14   :  { %p2755_p9 = pnand %p2754_p8, %p2748_p5 }
  0x16   :  { %2758 = shalt.err (!%p2755_p9)
}
  0x17   :  { %s2851_s15 = smov 128   ;;  %s2852_s16 = smov 8  }
  0x18   :  { %68 = dma.hbm_to_vmem [thread:$0]  %s3874_s6, 2048, %s63_s30, [#allocation10], %s2851_s15, %s2851_s15, %s2852_s16  }
  0x19   :  { %s2853_s19 = smov [#allocation3]   ;;  %s2854_s21 = smov [#allocation8]  }
  0x1a   :  { %s28_s20 = sshll.u32 %s2853_s19, 4  ;;  %s53_s22 = sshll.u32 %s2854_s21, 4  ;;  %s29_s20 = int_to_ptr.vmem [resolvable:$true] %s28_s20  ;;  %s54_s22 = int_to_ptr.vmem [resolvable:$true] %s53_s22 }
  0x1b   :  { %s2767_s4 = scalar_lea.vmem %s29_s20, 2688  ;;  %p2772_p11 = scmp.lt.s32.totalorder %s29_s20, %s29_s20 }
  0x1c   :  { %p2768_p10 = scmp.ne.s32.totalorder %s29_s20, %s2767_s4  ;;  %p2773_p12 = scmp.lt.s32.totalorder %s2767_s4, %s2767_s4 }
  0x1e   :  { %p2774_p13 = por %p2773_p12, %p2772_p11 }
  0x20   :  { %p2775_p0 = pnand %p2774_p13, %p2768_p10 }
  0x22   :  { %2778 = shalt.err (!%p2775_p0)
}
  0x23   :  { %34 = dma.hbm_to_vmem [thread:$0]  %s3871_s3, 2688, %s29_s20, [#allocation4], %s2849_s10, %s2849_s10, %s2850_s11  }
  0x24   :  { %s2787_s25 = scalar_lea.vmem %s54_s22, 16  ;;  %s2791_s6 = scalar_lea.vmem %s54_s22, 32 }
  0x25   :  { %p2788_p1 = scmp.ne.s32.totalorder %s54_s22, %s2787_s25  ;;  %p2792_p2 = scmp.lt.s32.totalorder %s54_s22, %s54_s22 }
  0x26   :  { %p2793_p3 = scmp.lt.s32.totalorder %s2791_s6, %s2787_s25 }
  0x28   :  { %p2794_p4 = por %p2793_p3, %p2792_p2 }
  0x2a   :  { %p2795_p5 = pnand %p2794_p4, %p2788_p1 }
  0x2c   :  { %2798 = shalt.err (!%p2795_p5)
}
  0x2d   :  { %56 = dma.hbm_to_vmem [thread:$0]  %s3873_s5, 16, %s54_s22, [#allocation7]  }
  0x2e   :  { %s2855_s28 = smov [#allocation11]  }
  0x2f   :  { %s75_s29 = sshll.u32 %s2855_s28, 4  ;;  %s76_s29 = int_to_ptr.vmem [resolvable:$true] %s75_s29 }
  0x30   :  { %s2807_s30 = scalar_lea.vmem %s76_s29, 16  ;;  %s2811_s9 = scalar_lea.vmem %s76_s29, 32 }
  0x31   :  { %p2808_p6 = scmp.ne.s32.totalorder %s76_s29, %s2807_s30  ;;  %p2812_p7 = scmp.lt.s32.totalorder %s76_s29, %s76_s29 }
  0x32   :  { %p2813_p8 = scmp.lt.s32.totalorder %s2811_s9, %s2807_s30 }
  0x34   :  { %p2814_p9 = por %p2813_p8, %p2812_p7 }
  0x36   :  { %p2815_p10 = pnand %p2814_p9, %p2808_p6 }
  0x38   :  { %2818 = shalt.err (!%p2815_p10)
}
  0x39   :  { %78 = dma.hbm_to_vmem [thread:$0]  %s3875_s7, 16, %s76_s29, [#allocation10]  }
  0x3a   :  { %2839 = dma.done.wait [#allocation4], 2688  }
  0x3b   :  { %2840 = vsyncadd [#allocation4], 4294964608 }
  0x3c   :  { %2841 = dma.done.wait [#allocation7], 6160  }
  0x3d   :  { %2842 = vsyncadd [#allocation7], 4294961136 }
  0x3e   :  { %2843 = dma.done.wait [#allocation10], 2064  }
  0x3f   :  { %2844 = vsyncadd [#allocation10], 4294965232  ;;  %v2856_v0 = vmov 0   ;;  %v94_v1 = vld [vmem:[%s3868_s0] sm:$0xff]  ;;  %s2857_s12 = smov 125   ;;  %s2858_s13 = smov 127   ;;  %v109_v34 = vlaneseq }
  0x40   :  { %2588 = vset.pattern.permute.xlu1 %v2856_v0  ;;  %2589 = vset.pattern.permute.xlu0 %v2856_v0  ;;  %s2859_s7 = smov 124   ;;  %s2860_s14 = smov 126   ;;  %v178_v2 = vld [vmem:[#allocation3 + $0x98] sm:$0xff]  ;;  %v177_v3 = vld [vmem:[#allocation3 + $0x90] sm:$0xff]  ;;  %v175_v4 = vld [vmem:[#allocation3 + $0x80] sm:$0xff]  ;;  %v3877_v6 = vmov 0.0  }
  0x41   :  { %99 = vrot.lane.b32.xlu1 %v94_v1, %s2857_s12  ;;  %95 = vrot.lane.b32.xlu0 %v94_v1, %s2858_s13  ;;  %s2861_s15 = smov 122   ;;  %s2862_s16 = smov 123   ;;  %v174_v5 = vld [vmem:[#allocation3 + $0x78] sm:$0xff]  ;;  %v172_v7 = vld [vmem:[#allocation3 + $0x68] sm:$0xff]  ;;  %v179_v8 = vld [vmem:[#allocation3 + $0xa0] sm:$0xff]  ;;  %v2947_v36 = vand.u32 127, %v109_v34 }
  0x42   :  { %s2863_s17 = smov 121   ;;  %223 = vmatprep.subr.mxu0 %v178_v2  ;;  %269 = vmatprep.mubr.f32.mxu0 %v3877_v6  ;;  %v171_v9 = vld [vmem:[#allocation3 + $0x60] sm:$0xff]  ;;  %v176_v10 = vld [vmem:[#allocation3 + $0x88] sm:$0xff]  ;;  %v169_v11 = vld [vmem:[#allocation3 + $0x50] sm:$0xff]  ;;  %vm180_vm3 = vcmask 457728   ;;  %vm1900_vm15 = vcmask 64512  }
  0x43   :  { %224 = vmatpush1.msra.mxu0 %v177_v3  ;;  %2227 = vmatprep.subr.mxu1 %v179_v8  ;;  %v173_v12 = vld [vmem:[#allocation3 + $0x70] sm:$0xff]  ;;  %v168_v13 = vld [vmem:[#allocation3 + $0x48] sm:$0xff]  ;;  %v166_v14 = vld [vmem:[#allocation3 + $0x38] sm:$0xff] }
  0x44   :  { %225 = vmatprep.subr.mxu0 %v175_v4  ;;  %2228 = vmatpush3.msra.mxu1 %v179_v8  ;;  %v170_v15 = vld [vmem:[#allocation3 + $0x58] sm:$0xff]  ;;  %v165_v16 = vld [vmem:[#allocation3 + $0x30] sm:$0xff]  ;;  %v163_v17 = vld [vmem:[#allocation3 + $0x20] sm:$0xff] }
  0x45   :  { %101 = vrot.lane.b32.xlu1 %v94_v1, %s2859_s7  ;;  %97 = vrot.lane.b32.xlu0 %v94_v1, %s2860_s14  ;;  %v167_v18 = vld [vmem:[#allocation3 + $0x40] sm:$0xff]  ;;  %v162_v19 = vld [vmem:[#allocation3 + $0x18] sm:$0xff]  ;;  %v160_v20 = vld [vmem:[#allocation3 + $0x8] sm:$0xff] }
  0x46   :  { %226 = vmatpush1.msra.mxu0 %v174_v5  ;;  %2229 = vmatprep.subr.mxu1 %v176_v10  ;;  %v164_v21 = vld [vmem:[#allocation3 + $0x28] sm:$0xff]  ;;  %v159_v22 = vld [vmem:[#allocation3] sm:$0xff]  ;;  %v2933_v23 = vld [vmem:[#allocation6 + $0x170] sm:$0xff] }
  0x47   :  { %227 = vmatprep.subr.mxu0 %v172_v7  ;;  %2230 = vmatpush3.msra.mxu1 %v176_v10  ;;  %3897 = vst [vmem:[#allocation17_spill] sm:$0xff] %v2933_v23  ;;  %v161_v24 = vld [vmem:[#allocation3 + $0x10] sm:$0xff]  ;;  %v2940_v31 = vld [vmem:[%s3869_s1] sm:$0xff]  ;;  %v2960_v42 = vld [vmem:[#allocation6 + $0x150] sm:$0xff] }
  0x48   :  { %228 = vmatpush1.msra.mxu0 %v171_v9  ;;  %2231 = vmatprep.subr.mxu1 %v173_v12  ;;  %vm849_vm0 = vcmp.eq.s32.totalorder %v2940_v31, 1  ;;  %vm676_vm1 = vcmp.eq.s32.totalorder %v2940_v31, 0  ;;  %vm1022_vm2 = vcmp.eq.s32.totalorder %v2940_v31, 2  ;;  %v2952_v39 = vld [vmem:[#allocation6 + $0x168] sm:$0xff]  ;;  %vm1195_vm5 = vcmp.eq.s32.totalorder %v2940_v31, 3  ;;  %v2956_v41 = vld [vmem:[#allocation6 + $0x158] sm:$0xff] }
  0x49   :  { %105 = vrot.lane.b32.xlu1 %v94_v1, %s2861_s15  ;;  %103 = vrot.lane.b32.xlu0 %v94_v1, %s2862_s16  ;;  %v850_v33 = vsel %vm849_vm0, 1, %v2856_v0  ;;  %v677_v35 = vsel %vm676_vm1, 1, %v2856_v0  ;;  %v1023_v38 = vsel %vm1022_vm2, 1, %v2856_v0  ;;  %v2963_v43 = vld [vmem:[#allocation6 + $0x140] sm:$0xff]  ;;  %v1196_v44 = vsel %vm1195_vm5, 1, %v2856_v0  ;;  %v2968_v45 = vld [vmem:[#allocation6 + $0x138] sm:$0xff] }
  0x4a   :  { %229 = vmatprep.subr.mxu0 %v169_v11  ;;  %2232 = vmatpush3.msra.mxu1 %v173_v12  ;;  %vm1368_vm6 = vcmp.eq.s32.totalorder %v2940_v31, 4  ;;  %v2972_v46 = vld [vmem:[#allocation6 + $0x128] sm:$0xff]  ;;  %v2975_v47 = vld [vmem:[#allocation6 + $0x120] sm:$0xff]  ;;  %v2978_v48 = vld [vmem:[#allocation6 + $0x110] sm:$0xff]  ;;  %vm1541_vm7 = vcmp.eq.s32.totalorder %v2940_v31, 5  ;;  %vm1714_vm8 = vcmp.eq.s32.totalorder %v2940_v31, 6 }
  0x4b   :  { %230 = vmatpush1.msra.mxu0 %v168_v13  ;;  %2233 = vmatprep.subr.mxu1 %v170_v15  ;;  %v1369_v49 = vsel %vm1368_vm6, 1, %v2856_v0  ;;  %v2982_v50 = vld [vmem:[#allocation6 + $0x108] sm:$0xff]  ;;  %v2986_v51 = vld [vmem:[#allocation6 + $0xf8] sm:$0xff]  ;;  %v2989_v52 = vld [vmem:[#allocation6 + $0xf0] sm:$0xff]  ;;  %v1542_v54 = vsel %vm1541_vm7, 1, %v2856_v0  ;;  %v1715_v59 = vsel %vm1714_vm8, 1, %v2856_v0 }
  0x4c   :  { %231 = vmatprep.subr.mxu0 %v166_v14  ;;  %2234 = vmatpush3.msra.mxu1 %v170_v15  ;;  %v2992_v53 = vld [vmem:[#allocation6 + $0xe0] sm:$0xff]  ;;  %v2996_v55 = vld [vmem:[#allocation6 + $0xd8] sm:$0xff]  ;;  %v3000_v56 = vld [vmem:[#allocation6 + $0xc8] sm:$0xff]  ;;  %vm1887_vm9 = vcmp.eq.s32.totalorder %v2940_v31, 7 }
  0x4d   :  { %107 = vrot.lane.b32.xlu0 %v94_v1, %s2863_s17  ;;  %112 = vperm.xlu1 %2588, %v94_v1   ;;  %v3003_v57 = vld [vmem:[#allocation6 + $0xc0] sm:$0xff]  ;;  %v3006_v58 = vld [vmem:[#allocation6 + $0xb0] sm:$0xff]  ;;  %v3010_v60 = vld [vmem:[#allocation6 + $0xa8] sm:$0xff]  ;;  %v1888_v1 = vsel %vm1887_vm9, 1, %v2856_v0 }
  0x4e   :  { %232 = vmatpush1.msra.mxu0 %v165_v16  ;;  %2235 = vmatprep.subr.mxu1 %v167_v18  ;;  %v3014_v61 = vld [vmem:[#allocation6 + $0x98] sm:$0xff]  ;;  %v3017_v62 = vld [vmem:[#allocation6 + $0x90] sm:$0xff]  ;;  %v3020_v63 = vld [vmem:[#allocation6 + $0x80] sm:$0xff] }
  0x4f   :  { %233 = vmatprep.subr.mxu0 %v163_v17  ;;  %2236 = vmatpush3.msra.mxu1 %v167_v18  ;;  %v3024_v2 = vld [vmem:[#allocation6 + $0x78] sm:$0xff]  ;;  %v3027_v3 = vld [vmem:[#allocation6 + $0x68] sm:$0xff]  ;;  %v3030_v4 = vld [vmem:[#allocation6 + $0x60] sm:$0xff] }
  0x50   :  { %234 = vmatpush1.msra.mxu0 %v162_v19  ;;  %2237 = vmatprep.subr.mxu1 %v164_v21  ;;  %v3033_v5 = vld [vmem:[#allocation6 + $0x50] sm:$0xff]  ;;  %v3036_v0 = vld [vmem:[#allocation6 + $0x48] sm:$0xff]  ;;  %v3039_v7 = vld [vmem:[#allocation6 + $0x38] sm:$0xff] }
  0x51   :  { %235 = vmatprep.subr.mxu0 %v160_v20  ;;  %2238 = vmatpush3.msra.mxu1 %v164_v21  ;;  %v3042_v8 = vld [vmem:[#allocation6 + $0x30] sm:$0xff]  ;;  %v3045_v9 = vld [vmem:[#allocation6 + $0x20] sm:$0xff]  ;;  %v3048_v10 = vld [vmem:[#allocation6 + $0x18] sm:$0xff] }
  0x52   :  { %236 = vmatpush1.msra.mxu0 %v159_v22  ;;  %2239 = vmatprep.subr.mxu1 %v161_v24  ;;  %v3051_v11 = vld [vmem:[#allocation6 + $0x8] sm:$0xff]  ;;  %v3054_v12 = vld [vmem:[#allocation6] sm:$0xff]  ;;  %v3061_v14 = vld [vmem:[#allocation6 + $0x178] sm:$0xff] }
  0x53   :  { %513 = vmatprep.subr.mxu0 %v2933_v23  ;;  %2240 = vmatpush3.msra.mxu1 %v161_v24  ;;  %3898 = vst [vmem:[#allocation18_spill] sm:$0xff] %v3051_v11  ;;  %3899 = vst [vmem:[#allocation19_spill] sm:$0xff] %v3054_v12  ;;  %v3066_v16 = vld [vmem:[#allocation6 + $0x160] sm:$0xff]  ;;  %v3074_v20 = vld [vmem:[#allocation6 + $0x148] sm:$0xff] }
  0x54   :  { %2253 = vmatprep.subr.mxu1 %v3877_v6 }
  0xb3   :  { %v100_v25 = vpop.permute.xlu1 %99  ;;  %v96_v26 = vpop.permute.xlu0 %95 }
  0xb4   :  { %115 = vperm.xlu0 %2589, %v96_v26  }
  0xb7   :  { %v102_v27 = vpop.permute.xlu1 %101  ;;  %v98_v28 = vpop.permute.xlu0 %97 }
  0xb8   :  { %124 = vperm.xlu0 %2589, %v102_v27   ;;  %118 = vperm.xlu1 %2588, %v98_v28   ;;  %v1898_v27 = vld [vmem:[%s3870_s2] sm:$0xff]  ;;  %s2866_s2 = smov [#allocation12]  }
  0xb9   :  { %s2006_s20 = sshll.u32 %s2866_s2, 4  ;;  %s2007_s20 = int_to_ptr.vmem [resolvable:$true] %s2006_s20 }
  0xba   :  { %s2819_s21 = scalar_lea.vmem %s2007_s20, 128  ;;  %p2824_p12 = scmp.lt.s32.totalorder %s2007_s20, %s2007_s20 }
  0xbb   :  { %v106_v29 = vpop.permute.xlu1 %105  ;;  %v104_v30 = vpop.permute.xlu0 %103  ;;  %p2820_p11 = scmp.ne.s32.totalorder %s2007_s20, %s2819_s21  ;;  %p2825_p13 = scmp.lt.s32.totalorder %s2819_s21, %s2819_s21 }
  0xbc   :  { %130 = vperm.xlu0 %2589, %v106_v29   ;;  %121 = vperm.xlu1 %2588, %v100_v25   ;;  %v3085_v25 = vld [vmem:[#allocation6 + $0x130] sm:$0xff] }
  0xbd   :  { %p2826_p0 = por %p2825_p13, %p2824_p12 }
  0xbf   :  { %v108_v32 = vpop.permute.xlu0 %107  ;;  %p2827_p1 = pnand %p2826_p0, %p2820_p11 }
  0xc0   :  { %1895 = vperm.xlu0 %2589, %v2940_v31   ;;  %127 = vperm.xlu1 %2588, %v104_v30  }
  0xc4   :  { %852 = vperm.xlu0 %2589, %v850_v33   ;;  %133 = vperm.xlu1 %2588, %v108_v32   ;;  %v3101_v32 = vld [vmem:[#allocation6 + $0x118] sm:$0xff] }
  0xc8   :  { %679 = vperm.xlu1 %2588, %v677_v35   ;;  %v113_v37 = vpop.permute.xlu1 %112 }
  0xc9   :  { %vm135_vm4 = vcmp.eq.s32.totalorder %v113_v37, %v2947_v36  ;;  %v3110_v37 = vld [vmem:[#allocation6 + $0x100] sm:$0xff] }
  0xca   :  { %v2017_v40 = vsel %vm135_vm4, 1.0, %v3877_v6  ;;  %vm2865_vm4 = vmmov 0  }
  0xcb   :  { %2025 = vmatmul.mubr.msk.f32.vlgmr.msra.gmra.mxu0 %vm180_vm3, %v2017_v40  ;;  %2241 = vmatprep.mubr.msk.f32.mxu1 %vm180_vm3, %v2017_v40  ;;  %v3116_v40 = vld [vmem:[#allocation6 + $0xe8] sm:$0xff] }
  0xcc   :  { %1025 = vperm.xlu1 %2588, %v1023_v38   ;;  %514 = vmatpush1.msra.mxu0 %v2952_v39 }
  0xcd   :  { %515 = vmatprep.subr.mxu0 %v2956_v41  ;;  %275 = vmatprep.mubr.f32.mxu0 %v3877_v6 }
  0xce   :  { %516 = vmatpush1.msra.mxu0 %v2960_v42 }
  0xcf   :  { %517 = vmatprep.subr.mxu0 %v2963_v43 }
  0xd0   :  { %1198 = vperm.xlu1 %2588, %v1196_v44   ;;  %518 = vmatpush1.msra.mxu0 %v2968_v45  ;;  %v3128_v44 = vld [vmem:[#allocation6 + $0xb8] sm:$0xff] }
  0xd1   :  { %519 = vmatprep.subr.mxu0 %v2972_v46 }
  0xd2   :  { %520 = vmatpush1.msra.mxu0 %v2975_v47 }
  0xd3   :  { %521 = vmatprep.subr.mxu0 %v2978_v48 }
  0xd4   :  { %1371 = vperm.xlu1 %2588, %v1369_v49   ;;  %522 = vmatpush1.msra.mxu0 %v2982_v50  ;;  %v3133_v49 = vld [vmem:[#allocation6 + $0xa0] sm:$0xff] }
  0xd5   :  { %523 = vmatprep.subr.mxu0 %v2986_v51 }
  0xd6   :  { %524 = vmatpush1.msra.mxu0 %v2989_v52 }
  0xd7   :  { %525 = vmatprep.subr.mxu0 %v2992_v53 }
  0xd8   :  { %1544 = vperm.xlu1 %2588, %v1542_v54   ;;  %526 = vmatpush1.msra.mxu0 %v2996_v55  ;;  %v3138_v54 = vld [vmem:[#allocation6 + $0x88] sm:$0xff] }
  0xd9   :  { %527 = vmatprep.subr.mxu0 %v3000_v56 }
  0xda   :  { %528 = vmatpush1.msra.mxu0 %v3003_v57 }
  0xdb   :  { %529 = vmatprep.subr.mxu0 %v3006_v58 }
  0xdc   :  { %1717 = vperm.xlu1 %2588, %v1715_v59   ;;  %530 = vmatpush1.msra.mxu0 %v3010_v60  ;;  %v3143_v59 = vld [vmem:[#allocation6 + $0x70] sm:$0xff] }
  0xdd   :  { %531 = vmatprep.subr.mxu0 %v3014_v61 }
  0xde   :  { %532 = vmatpush1.msra.mxu0 %v3017_v62 }
  0xdf   :  { %533 = vmatprep.subr.mxu0 %v3020_v63 }
  0xe0   :  { %1890 = vperm.xlu1 %2588, %v1888_v1   ;;  %534 = vmatpush1.msra.mxu0 %v3024_v2  ;;  %v3148_v1 = vld [vmem:[#allocation6 + $0x58] sm:$0xff] }
  0xe1   :  { %535 = vmatprep.subr.mxu0 %v3027_v3 }
  0xe2   :  { %536 = vmatpush1.msra.mxu0 %v3030_v4 }
  0xe3   :  { %537 = vmatprep.subr.mxu0 %v3033_v5 }
  0xe4   :  { %538 = vmatpush1.msra.mxu0 %v3036_v0 }
  0xe5   :  { %539 = vmatprep.subr.mxu0 %v3039_v7 }
  0xe6   :  { %540 = vmatpush1.msra.mxu0 %v3042_v8 }
  0xe7   :  { %541 = vmatprep.subr.mxu0 %v3045_v9 }
  0xe8   :  { %542 = vmatpush1.msra.mxu0 %v3048_v10 }
  0xe9   :  { %543 = vmatprep.subr.mxu0 %v3051_v11 }
  0xea   :  { %544 = vmatpush1.msra.mxu0 %v3054_v12 }
  0xeb   :  { %686 = vmatprep.subr.mxu0 %v2933_v23 }
 0x12f   :  { %v116_v13 = vpop.permute.xlu0 %115 }
 0x130   :  { %vm136_vm10 = vcmp.eq.s32.totalorder %v116_v13, %v2947_v36  ;;  %v3153_v13 = vld [vmem:[#allocation6 + $0x40] sm:$0xff] }
 0x131   :  { %v2018_v15 = vsel %vm136_vm10, 1.0, %v3877_v6 }
 0x132   :  { %2026 = vmatmul.mubr.msk.f32.gmra.mxu0 %vm180_vm3, %v2018_v15  ;;  %2242 = vmatmul.mubr.msk.f32.vlgmr.msra.gmra.mxu1 %vm180_vm3, %v2018_v15  ;;  %v3159_v15 = vld [vmem:[#allocation6 + $0x28] sm:$0xff] }
 0x133   :  { %v119_v17 = vpop.permute.xlu1 %118  ;;  %v125_v18 = vpop.permute.xlu0 %124  ;;  %281 = vmatprep.mubr.f32.mxu0 %v3877_v6  ;;  %2254 = vmatpush3.msra.mxu1 %v3061_v14  ;;  %3900 = vst [vmem:[#allocation20_spill] sm:$0xff] %v3159_v15 }
 0x134   :  { %vm137_vm11 = vcmp.eq.s32.totalorder %v119_v17, %v2947_v36  ;;  %2255 = vmatprep.subr.mxu1 %v3877_v6  ;;  %vm139_vm12 = vcmp.eq.s32.totalorder %v125_v18, %v2947_v36  ;;  %v3165_v17 = vld [vmem:[#allocation6 + $0x10] sm:$0xff] }
 0x135   :  { %v2019_v19 = vsel %vm137_vm11, 1.0, %v3877_v6  ;;  %2256 = vmatpush3.msra.mxu1 %v3066_v16  ;;  %v2021_v26 = vsel %vm139_vm12, 1.0, %v3877_v6  ;;  %3901 = vst [vmem:[#allocation21_spill] sm:$0xff] %v3165_v17 }
 0x136   :  { %2027 = vmatmul.mubr.msk.f32.gmra.mxu0 %vm180_vm3, %v2019_v19  ;;  %2244 = vmatprep.mubr.msk.f32.mxu1 %vm180_vm3, %v2019_v19 }
 0x137   :  { %v122_v21 = vpop.permute.xlu1 %121  ;;  %v131_v22 = vpop.permute.xlu0 %130  ;;  %287 = vmatprep.mubr.f32.mxu0 %v3877_v6  ;;  %2257 = vmatprep.subr.mxu1 %v3877_v6 }
 0x138   :  { %vm138_vm13 = vcmp.eq.s32.totalorder %v122_v21, %v2947_v36  ;;  %2258 = vmatpush3.msra.mxu1 %v3074_v20  ;;  %vm141_vm14 = vcmp.eq.s32.totalorder %v131_v22, %v2947_v36 }
 0x139   :  { %v2020_v24 = vsel %vm138_vm13, 1.0, %v3877_v6  ;;  %2259 = vmatprep.subr.mxu1 %v3877_v6  ;;  %v2023_v33 = vsel %vm141_vm14, 1.0, %v3877_v6 }
 0x13a   :  { %2028 = vmatmul.mubr.msk.f32.gmra.mxu0 %vm180_vm3, %v2020_v24  ;;  %2245 = vmatmul.mubr.msk.f32.gmra.mxu1 %vm180_vm3, %v2020_v24 }
 0x13b   :  { %v128_v28 = vpop.permute.xlu1 %127  ;;  %2247 = vmatprep.mubr.msk.f32.mxu1 %vm180_vm3, %v2021_v26  ;;  %v1896_v29 = vpop.permute.xlu0 %1895  ;;  %293 = vmatprep.mubr.f32.mxu0 %v3877_v6 }
 0x13c   :  { %vm140_vm0 = vcmp.eq.s32.totalorder %v128_v28, %v2947_v36  ;;  %vm1897_vm1 = vcmp.eq.s32.totalorder %v2947_v36, %v1896_v29  ;;  %2260 = vmatpush3.msra.mxu1 %v3085_v25 }
 0x13d   :  { %v2022_v30 = vsel %vm140_vm0, 1.0, %v3877_v6  ;;  %v1899_v31 = vsel %vm1897_vm1, %v1898_v27, 0.0  ;;  %2261 = vmatprep.subr.mxu1 %v3877_v6 }
 0x13e   :  { %2029 = vmatmul.mubr.msk.f32.gmra.mxu0 %vm180_vm3, %v2021_v26  ;;  %2248 = vmatmul.mubr.msk.f32.gmra.mxu1 %vm180_vm3, %v2022_v30  ;;  %v1901_v34 = vsel %vm1900_vm15, %v1899_v31, 0.0 }
 0x13f   :  { %v134_v35 = vpop.permute.xlu1 %133  ;;  %2250 = vmatprep.mubr.msk.f32.mxu1 %vm180_vm3, %v2023_v33  ;;  %1902 = vadd.xlane.f32.xlu0 %v1901_v34 }
 0x140   :  { %vm142_vm2 = vcmp.eq.s32.totalorder %v134_v35, %v2947_v36  ;;  %299 = vmatprep.mubr.f32.mxu0 %v3877_v6  ;;  %2262 = vmatpush3.msra.mxu1 %v3101_v32  ;;  %v3121_v36 = vld [vmem:[#allocation6 + $0xd0] sm:$0xff] }
 0x141   :  { %v2024_v38 = vsel %vm142_vm2, 1.0, %v3877_v6  ;;  %2263 = vmatprep.subr.mxu1 %v3877_v6 }
 0x142   :  { %2030 = vmatmul.mubr.msk.f32.gmra.mxu0 %vm180_vm3, %v2022_v30  ;;  %2251 = vmatmul.mubr.msk.f32.gmra.mxu1 %vm180_vm3, %v2024_v38 }
 0x143   :  { %305 = vmatprep.mubr.f32.mxu0 %v3877_v6  ;;  %2264 = vmatpush3.msra.mxu1 %v3110_v37 }
 0x144   :  { %2265 = vmatprep.subr.mxu1 %v3877_v6  ;;  %2285 = vmatprep.mubr.msk.f32.mxu1 %vm2865_vm4, %v3877_v6 }
 0x145   :  { %2266 = vmatpush3.msra.mxu1 %v3116_v40 }
 0x146   :  { %2031 = vmatmul.mubr.msk.f32.gmra.mxu0 %vm180_vm3, %v2023_v33  ;;  %2267 = vmatprep.subr.mxu1 %v3877_v6 }
 0x147   :  { %311 = vmatprep.mubr.f32.mxu0 %v3877_v6  ;;  %2268 = vmatpush3.msra.mxu1 %v3121_v36 }
 0x148   :  { %2269 = vmatprep.subr.mxu1 %v3877_v6 }
 0x149   :  { %2270 = vmatpush3.msra.mxu1 %v3128_v44 }
 0x14a   :  { %2032 = vmatmul.mubr.msk.f32.gmra.mxu0 %vm180_vm3, %v2024_v38  ;;  %2271 = vmatprep.subr.mxu1 %v3877_v6 }
 0x14b   :  { %577 = vmatprep.mubr.f32.mxu0 %v3877_v6  ;;  %2272 = vmatpush3.msra.mxu1 %v3133_v49 }
 0x14c   :  { %2273 = vmatprep.subr.mxu1 %v3877_v6 }
 0x14d   :  { %2274 = vmatpush3.msra.mxu1 %v3138_v54 }
 0x14e   :  { %578 = vmatmul.mubr.f32.vlgmr.msra.gmra.mxu0 %v3877_v6  ;;  %2275 = vmatprep.subr.mxu1 %v3877_v6 }
 0x14f   :  { %2276 = vmatpush3.msra.mxu1 %v3143_v59  ;;  %687 = vmatpush1.msra.mxu0 %v2952_v39 }
 0x150   :  { %2277 = vmatprep.subr.mxu1 %v3877_v6  ;;  %688 = vmatprep.subr.mxu0 %v2956_v41 }
 0x151   :  { %2278 = vmatpush3.msra.mxu1 %v3148_v1  ;;  %689 = vmatpush1.msra.mxu0 %v2960_v42 }
 0x152   :  { %2279 = vmatprep.subr.mxu1 %v3877_v6  ;;  %690 = vmatprep.subr.mxu0 %v2963_v43 }
 0x153   :  { %2280 = vmatpush3.msra.mxu1 %v3153_v13  ;;  %691 = vmatpush1.msra.mxu0 %v2968_v45 }
 0x154   :  { %2281 = vmatprep.subr.mxu1 %v3877_v6  ;;  %692 = vmatprep.subr.mxu0 %v2972_v46 }
 0x155   :  { %2282 = vmatpush3.msra.mxu1 %v3159_v15  ;;  %693 = vmatpush1.msra.mxu0 %v2975_v47 }
 0x156   :  { %2283 = vmatprep.subr.mxu1 %v3877_v6  ;;  %694 = vmatprep.subr.mxu0 %v2978_v48 }
 0x157   :  { %2284 = vmatpush3.msra.mxu1 %v3165_v17  ;;  %695 = vmatpush1.msra.mxu0 %v2982_v50 }
 0x158   :  { %2286 = vmatmul.mubr.f32.vlgmr.msra.gmra.mxu1 %v3877_v6  ;;  %2288 = vmatprep.subr.mxu1 %v3877_v6 }
 0x159   :  { %2289 = vmatpush3.msra.mxu1 %v3061_v14  ;;  %696 = vmatprep.subr.mxu0 %v2986_v51 }
 0x15a   :  { %2290 = vmatprep.subr.mxu1 %v3877_v6  ;;  %697 = vmatpush1.msra.mxu0 %v2989_v52 }
 0x15b   :  { %2291 = vmatpush3.msra.mxu1 %v3066_v16  ;;  %698 = vmatprep.subr.mxu0 %v2992_v53 }
 0x15c   :  { %2292 = vmatprep.subr.mxu1 %v3877_v6  ;;  %699 = vmatpush1.msra.mxu0 %v2996_v55 }
 0x15d   :  { %2293 = vmatpush3.msra.mxu1 %v3074_v20  ;;  %700 = vmatprep.subr.mxu0 %v3000_v56 }
 0x15e   :  { %2294 = vmatprep.subr.mxu1 %v3877_v6  ;;  %701 = vmatpush1.msra.mxu0 %v3003_v57 }
 0x15f   :  { %2295 = vmatpush3.msra.mxu1 %v3085_v25  ;;  %702 = vmatprep.subr.mxu0 %v3006_v58 }
 0x160   :  { %2296 = vmatprep.subr.mxu1 %v3877_v6  ;;  %703 = vmatpush1.msra.mxu0 %v3010_v60 }
 0x161   :  { %2297 = vmatpush3.msra.mxu1 %v3101_v32  ;;  %704 = vmatprep.subr.mxu0 %v3014_v61 }
 0x162   :  { %2298 = vmatprep.subr.mxu1 %v3877_v6  ;;  %705 = vmatpush1.msra.mxu0 %v3017_v62 }
 0x163   :  { %2299 = vmatpush3.msra.mxu1 %v3110_v37  ;;  %706 = vmatprep.subr.mxu0 %v3020_v63 }
 0x164   :  { %2300 = vmatprep.subr.mxu1 %v3877_v6  ;;  %707 = vmatpush1.msra.mxu0 %v3024_v2 }
 0x165   :  { %2301 = vmatpush3.msra.mxu1 %v3116_v40  ;;  %708 = vmatprep.subr.mxu0 %v3027_v3 }
 0x166   :  { %2302 = vmatprep.subr.mxu1 %v3877_v6  ;;  %709 = vmatpush1.msra.mxu0 %v3030_v4 }
 0x167   :  { %2303 = vmatpush3.msra.mxu1 %v3121_v36  ;;  %710 = vmatprep.subr.mxu0 %v3033_v5 }
 0x168   :  { %2304 = vmatprep.subr.mxu1 %v3877_v6  ;;  %711 = vmatpush1.msra.mxu0 %v3036_v0 }
 0x169   :  { %2305 = vmatpush3.msra.mxu1 %v3128_v44  ;;  %712 = vmatprep.subr.mxu0 %v3039_v7 }
 0x16a   :  { %2306 = vmatprep.subr.mxu1 %v3877_v6  ;;  %713 = vmatpush1.msra.mxu0 %v3042_v8 }
 0x16b   :  { %2307 = vmatpush3.msra.mxu1 %v3133_v49  ;;  %714 = vmatprep.subr.mxu0 %v3045_v9 }
 0x16c   :  { %2308 = vmatprep.subr.mxu1 %v3877_v6  ;;  %715 = vmatpush1.msra.mxu0 %v3048_v10 }
 0x16d   :  { %2309 = vmatpush3.msra.mxu1 %v3138_v54  ;;  %716 = vmatprep.subr.mxu0 %v3051_v11 }
 0x16e   :  { %2310 = vmatprep.subr.mxu1 %v3877_v6  ;;  %717 = vmatpush1.msra.mxu0 %v3054_v12 }
 0x16f   :  { %2311 = vmatpush3.msra.mxu1 %v3143_v59  ;;  %750 = vmatprep.mubr.f32.mxu0 %v3877_v6 }
 0x170   :  { %2312 = vmatprep.subr.mxu1 %v3877_v6  ;;  %2320 = vmatprep.mubr.msk.f32.mxu1 %vm2865_vm4, %v3877_v6 }
 0x171   :  { %2313 = vmatpush3.msra.mxu1 %v3148_v1  ;;  %859 = vmatprep.subr.mxu0 %v2933_v23 }
 0x172   :  { %2314 = vmatprep.subr.mxu1 %v3877_v6 }
 0x173   :  { %2315 = vmatpush3.msra.mxu1 %v3153_v13 }
 0x174   :  { %2316 = vmatprep.subr.mxu1 %v3877_v6 }
 0x175   :  { %2317 = vmatpush3.msra.mxu1 %v3159_v15 }
 0x176   :  { %2318 = vmatprep.subr.mxu1 %v3877_v6 }
 0x177   :  { %2319 = vmatpush3.msra.mxu1 %v3165_v17  ;;  %v3276_v17 = vld [vmem:[#allocation8] ss:$0 sm:$0xff] }
 0x178   :  { %2323 = vmatprep.subr.mxu1 %v3877_v6 }
 0x18b   :  { %v271_v18 = vpop.f32.mrf.mxu0 }
 0x18d   :  { %v273_v19 = vpop.f32.mrf.mxu0 }
 0x1f2   :  { %v3234_v21 = vpop.f32.mrf.mxu0  ;;  %v3244_v28 = vpop.f32.mrf.mxu1 }
 0x1f3   :  { %3902 = vst [vmem:[#allocation22_spill] sm:$0xff] %v3234_v21  ;;  %3907 = vst [vmem:[#allocation27_spill] sm:$0xff] %v3244_v28 }
 0x1f4   :  { %v3236_v22 = vpop.f32.mrf.mxu0  ;;  %v384_v31 = vpop.f32.mrf.mxu1 }
 0x1f5   :  { %3903 = vst [vmem:[#allocation23_spill] sm:$0xff] %v3236_v22 }
 0x1f6   :  { %v3238_v24 = vpop.f32.mrf.mxu0 }
 0x1f7   :  { %3904 = vst [vmem:[#allocation24_spill] sm:$0xff] %v3238_v24 }
 0x1f8   :  { %v3240_v26 = vpop.f32.mrf.mxu0 }
 0x1f9   :  { %3905 = vst [vmem:[#allocation25_spill] sm:$0xff] %v3240_v26 }
 0x1fa   :  { %v3242_v27 = vpop.f32.mrf.mxu0  ;;  %v3252_v34 = vpop.f32.mrf.mxu1 }
 0x1fb   :  { %3906 = vst [vmem:[#allocation26_spill] sm:$0xff] %v3242_v27  ;;  %3911 = vst [vmem:[#allocation31_spill] sm:$0xff] %v3252_v34 }
 0x1fc   :  { %v3246_v29 = vpop.f32.mrf.mxu0  ;;  %v3258_v6 = vpop.f32.mrf.mxu1 }
 0x1fd   :  { %3908 = vst [vmem:[#allocation28_spill] sm:$0xff] %v3246_v29  ;;  %3914 = vst [vmem:[#allocation34_spill] sm:$0xff] %v3258_v6 }
 0x1fe   :  { %v3248_v30 = vpop.f32.mrf.mxu0  ;;  %v3264_v24 = vpop.f32.mrf.mxu1 }
 0x1ff   :  { %3909 = vst [vmem:[#allocation29_spill] sm:$0xff] %v3248_v30  ;;  %3917 = vst [vmem:[#allocation37_spill] sm:$0xff] %v3264_v24 }
 0x200   :  { %v3250_v33 = vpop.f32.mrf.mxu0  ;;  %v3270_v28 = vpop.f32.mrf.mxu1 }
 0x201   :  { %3910 = vst [vmem:[#allocation30_spill] sm:$0xff] %v3250_v33  ;;  %3920 = vst [vmem:[#allocation40_spill] sm:$0xff] %v3270_v28 }
 0x202   :  { %v3254_v35 = vpop.f32.mrf.mxu0 }
 0x203   :  { %3912 = vst [vmem:[#allocation32_spill] sm:$0xff] %v3254_v35  ;;  %v3272_v35 = vpop.f32.mrf.mxu1 }
 0x204   :  { %v3256_v38 = vpop.f32.mrf.mxu0  ;;  %3921 = vst [vmem:[#allocation41_spill] sm:$0xff] %v3272_v35 }
 0x205   :  { %3913 = vst [vmem:[#allocation33_spill] sm:$0xff] %v3256_v38  ;;  %v3274_v21 = vpop.f32.mrf.mxu1 }
 0x206   :  { %v3260_v26 = vpop.f32.mrf.mxu0  ;;  %3922 = vst [vmem:[#allocation42_spill] sm:$0xff] %v3274_v21 }
 0x207   :  { %3915 = vst [vmem:[#allocation35_spill] sm:$0xff] %v3260_v26 }
 0x208   :  { %v3262_v27 = vpop.f32.mrf.mxu0 }
 0x209   :  { %3916 = vst [vmem:[#allocation36_spill] sm:$0xff] %v3262_v27 }
 0x20a   :  { %v3266_v29 = vpop.f32.mrf.mxu0 }
 0x20b   :  { %3918 = vst [vmem:[#allocation38_spill] sm:$0xff] %v3266_v29 }
 0x20c   :  { %v3268_v30 = vpop.f32.mrf.mxu0 }
 0x20d   :  { %3919 = vst [vmem:[#allocation39_spill] sm:$0xff] %v3268_v30 }
 0x20e   :  { %v579_v33 = vpop.f32.mrf.mxu0 }
 0x20f   :  { %v654_v34 = vadd.f32 %v579_v33, %v271_v18 }
 0x210   :  { %v581_v38 = vpop.f32.mrf.mxu0 }
 0x211   :  { %v2042_v22 = vmul.f32 -1.442695, %v654_v34  ;;  %v661_v6 = vadd.f32 %v581_v38, %v273_v19 }
 0x213   :  { %2590 = vpow2.f32 %v2042_v22  ;;  %v2043_v27 = vmul.f32 -1.442695, %v661_v6 }
 0x215   :  { %2592 = vpow2.f32 %v2043_v27 }
 0x218   :  { %v650_v26 = vpop.f32.mrf.mxu1 }
 0x219   :  { %v668_v18 = vadd.f32 %v3276_v17, %v650_v26  ;;  %v3925_v26 = vld [vmem:[#allocation21_spill] sm:$0xff] }
 0x21a   :  { %v2287_v23 = vpop.f32.mrf.mxu1 }
 0x220   :  { %v2591_v24 = vpop.eup %2590 }
 0x221   :  { %v658_v29 = vadd.f32 1.0, %v2591_v24  ;;  %v3924_v24 = vmov 0.0  }
 0x222   :  { %v2593_v30 = vpop.eup %2592 }
 0x223   :  { %2594 = vrcp.f32 %v658_v29  ;;  %v665_v28 = vadd.f32 1.0, %v2593_v30 }
 0x225   :  { %2596 = vrcp.f32 %v665_v28  ;;  %v3926_v28 = vld [vmem:[#allocation17_spill] sm:$0xff] }
 0x230   :  { %v2595_v33 = vpop.eup %2594 }
 0x231   :  { %v669_v34 = vmul.f32 %v2595_v33, %v668_v18 }
 0x232   :  { %v2597_v19 = vpop.eup %2596 }
 0x233   :  { %v670_v22 = vadd.f32 %v669_v34, %v384_v31  ;;  %v672_v38 = vsub.f32 1.0, %v2597_v19  ;;  %v674_v23 = vmul.f32 0.0, %v2597_v19  ;;  %v3927_v31 = vld [vmem:[#allocation22_spill] sm:$0xff] }
 0x235   :  { %2598 = vtanh.f32 %v670_v22  ;;  %v3928_v22 = vld [vmem:[#allocation23_spill] sm:$0xff] }
 0x242   :  { %v2599_v35 = vpop.eup %2598 }
 0x243   :  { %v673_v6 = vmul.f32 %v2599_v35, %v672_v38 }
 0x245   :  { %v3279_v27 = vadd.f32 %v674_v23, %v673_v6 }
 0x247   :  { %3923 = vst [vmem:[#allocation43_spill] sm:$0xff] %v3279_v27  ;;  %751 = vmatmul.mubr.f32.vlgmr.msra.gmra.mxu0 %v3279_v27  ;;  %2321 = vmatmul.mubr.f32.vlgmr.msra.gmra.mxu1 %v3279_v27 }
 0x248   :  { %860 = vmatpush1.msra.mxu0 %v2952_v39  ;;  %2324 = vmatpush3.msra.mxu1 %v3061_v14 }
 0x249   :  { %861 = vmatprep.subr.mxu0 %v2956_v41  ;;  %2325 = vmatprep.subr.mxu1 %v3924_v24 }
 0x24a   :  { %862 = vmatpush1.msra.mxu0 %v2960_v42  ;;  %2326 = vmatpush3.msra.mxu1 %v3066_v16 }
 0x24b   :  { %863 = vmatprep.subr.mxu0 %v2963_v43  ;;  %2327 = vmatprep.subr.mxu1 %v3924_v24 }
 0x24c   :  { %864 = vmatpush1.msra.mxu0 %v2968_v45  ;;  %2328 = vmatpush3.msra.mxu1 %v3074_v20 }
 0x24d   :  { %865 = vmatprep.subr.mxu0 %v2972_v46  ;;  %2329 = vmatprep.subr.mxu1 %v3924_v24 }
 0x24e   :  { %866 = vmatpush1.msra.mxu0 %v2975_v47  ;;  %2330 = vmatpush3.msra.mxu1 %v3085_v25 }
 0x24f   :  { %867 = vmatprep.subr.mxu0 %v2978_v48  ;;  %2331 = vmatprep.subr.mxu1 %v3924_v24 }
 0x250   :  { %868 = vmatpush1.msra.mxu0 %v2982_v50  ;;  %2332 = vmatpush3.msra.mxu1 %v3101_v32 }
 0x251   :  { %869 = vmatprep.subr.mxu0 %v2986_v51  ;;  %2333 = vmatprep.subr.mxu1 %v3924_v24 }
 0x252   :  { %870 = vmatpush1.msra.mxu0 %v2989_v52  ;;  %2334 = vmatpush3.msra.mxu1 %v3110_v37 }
 0x253   :  { %871 = vmatprep.subr.mxu0 %v2992_v53  ;;  %2335 = vmatprep.subr.mxu1 %v3924_v24 }
 0x254   :  { %872 = vmatpush1.msra.mxu0 %v2996_v55  ;;  %2336 = vmatpush3.msra.mxu1 %v3116_v40 }
 0x255   :  { %873 = vmatprep.subr.mxu0 %v3000_v56  ;;  %2337 = vmatprep.subr.mxu1 %v3924_v24 }
 0x256   :  { %874 = vmatpush1.msra.mxu0 %v3003_v57  ;;  %2338 = vmatpush3.msra.mxu1 %v3121_v36 }
 0x257   :  { %875 = vmatprep.subr.mxu0 %v3006_v58  ;;  %2339 = vmatprep.subr.mxu1 %v3924_v24 }
 0x258   :  { %876 = vmatpush1.msra.mxu0 %v3010_v60  ;;  %2340 = vmatpush3.msra.mxu1 %v3128_v44 }
 0x259   :  { %877 = vmatprep.subr.mxu0 %v3014_v61  ;;  %2341 = vmatprep.subr.mxu1 %v3924_v24 }
 0x25a   :  { %878 = vmatpush1.msra.mxu0 %v3017_v62  ;;  %2342 = vmatpush3.msra.mxu1 %v3133_v49 }
 0x25b   :  { %879 = vmatprep.subr.mxu0 %v3020_v63  ;;  %2343 = vmatprep.subr.mxu1 %v3924_v24 }
 0x25c   :  { %880 = vmatpush1.msra.mxu0 %v3024_v2  ;;  %2344 = vmatpush3.msra.mxu1 %v3138_v54 }
 0x25d   :  { %881 = vmatprep.subr.mxu0 %v3027_v3  ;;  %2345 = vmatprep.subr.mxu1 %v3924_v24 }
 0x25e   :  { %882 = vmatpush1.msra.mxu0 %v3030_v4  ;;  %2346 = vmatpush3.msra.mxu1 %v3143_v59 }
 0x25f   :  { %883 = vmatprep.subr.mxu0 %v3033_v5  ;;  %2347 = vmatprep.subr.mxu1 %v3924_v24 }
 0x260   :  { %884 = vmatpush1.msra.mxu0 %v3036_v0  ;;  %2348 = vmatpush3.msra.mxu1 %v3148_v1 }
 0x261   :  { %885 = vmatprep.subr.mxu0 %v3039_v7  ;;  %2349 = vmatprep.subr.mxu1 %v3924_v24 }
 0x262   :  { %886 = vmatpush1.msra.mxu0 %v3042_v8  ;;  %2350 = vmatpush3.msra.mxu1 %v3153_v13 }
 0x263   :  { %887 = vmatprep.subr.mxu0 %v3045_v9  ;;  %2351 = vmatprep.subr.mxu1 %v3924_v24 }
 0x264   :  { %888 = vmatpush1.msra.mxu0 %v3048_v10  ;;  %2352 = vmatpush3.msra.mxu1 %v3159_v15  ;;  %v3929_v15 = vld [vmem:[#allocation27_spill] sm:$0xff] }
 0x265   :  { %889 = vmatprep.subr.mxu0 %v3051_v11  ;;  %2353 = vmatprep.subr.mxu1 %v3924_v24 }
 0x266   :  { %890 = vmatpush1.msra.mxu0 %v3054_v12  ;;  %923 = vmatprep.mubr.f32.mxu0 %v3924_v24 }
 0x267   :  { %2354 = vmatpush3.msra.mxu1 %v3925_v26  ;;  %2355 = vmatprep.mubr.msk.f32.mxu1 %vm2865_vm4, %v3924_v24 }
 0x268   :  { %1032 = vmatprep.subr.mxu0 %v3926_v28  ;;  %2358 = vmatprep.subr.mxu1 %v3924_v24 }
 0x307   :  { %v752_v29 = vpop.f32.mrf.mxu0  ;;  %v823_v30 = vpop.f32.mrf.mxu1 }
 0x308   :  { %v827_v35 = vadd.f32 %v752_v29, %v3927_v31  ;;  %v841_v28 = vadd.f32 %v3276_v17, %v823_v30 }
 0x309   :  { %v2322_v18 = vpop.f32.mrf.mxu1  ;;  %v754_v34 = vpop.f32.mrf.mxu0 }
 0x30a   :  { %v2044_v33 = vmul.f32 -1.442695, %v827_v35  ;;  %v834_v19 = vadd.f32 %v754_v34, %v3928_v22 }
 0x30c   :  { %2600 = vpow2.f32 %v2044_v33  ;;  %v2045_v38 = vmul.f32 -1.442695, %v834_v19  ;;  %v3936_v19 = vld [vmem:[#allocation24_spill] sm:$0xff] }
 0x30e   :  { %2602 = vpow2.f32 %v2045_v38 }
 0x319   :  { %v2601_v6 = vpop.eup %2600 }
 0x31a   :  { %v831_v23 = vadd.f32 1.0, %v2601_v6 }
 0x31b   :  { %v2603_v21 = vpop.eup %2602 }
 0x31c   :  { %2604 = vrcp.f32 %v831_v23  ;;  %v838_v26 = vadd.f32 1.0, %v2603_v21  ;;  %v3934_v21 = vld [vmem:[#allocation21_spill] sm:$0xff] }
 0x31e   :  { %2606 = vrcp.f32 %v838_v26  ;;  %v3935_v26 = vld [vmem:[#allocation17_spill] sm:$0xff] }
 0x329   :  { %v2605_v12 = vpop.eup %2604 }
 0x32a   :  { %v842_v11 = vmul.f32 %v2605_v12, %v841_v28  ;;  %v3932_v12 = vld [vmem:[#allocation18_spill] sm:$0xff] }
 0x32b   :  { %v2607_v31 = vpop.eup %2606 }
 0x32c   :  { %v843_v29 = vadd.f32 %v3929_v15, %v842_v11  ;;  %v845_v35 = vsub.f32 1.0, %v2607_v31  ;;  %v847_v34 = vmul.f32 %v2607_v31, %v3279_v27  ;;  %v3931_v11 = vld [vmem:[#allocation20_spill] sm:$0xff]  ;;  %v3933_v15 = vld [vmem:[#allocation19_spill] sm:$0xff]  ;;  %v3937_v31 = vld [vmem:[#allocation25_spill] sm:$0xff] }
 0x32e   :  { %2608 = vtanh.f32 %v843_v29 }
 0x33b   :  { %v2609_v18 = vpop.eup %2608 }
 0x33c   :  { %v846_v33 = vmul.f32 %v2609_v18, %v845_v35 }
 0x33e   :  { %v3355_v22 = vadd.f32 %v847_v34, %v846_v33 }
 0x340   :  { %3930 = vst [vmem:[#allocation22_spill] sm:$0xff] %v3355_v22  ;;  %924 = vmatmul.mubr.f32.vlgmr.msra.gmra.mxu0 %v3355_v22  ;;  %2356 = vmatmul.mubr.f32.vlgmr.msra.gmra.mxu1 %v3355_v22 }
 0x341   :  { %1033 = vmatpush1.msra.mxu0 %v2952_v39  ;;  %2359 = vmatpush3.msra.mxu1 %v3061_v14 }
 0x342   :  { %1034 = vmatprep.subr.mxu0 %v2956_v41  ;;  %2360 = vmatprep.subr.mxu1 %v3924_v24 }
 0x343   :  { %1035 = vmatpush1.msra.mxu0 %v2960_v42  ;;  %2361 = vmatpush3.msra.mxu1 %v3066_v16 }
 0x344   :  { %1036 = vmatprep.subr.mxu0 %v2963_v43  ;;  %2362 = vmatprep.subr.mxu1 %v3924_v24 }
 0x345   :  { %1037 = vmatpush1.msra.mxu0 %v2968_v45  ;;  %2363 = vmatpush3.msra.mxu1 %v3074_v20 }
 0x346   :  { %1038 = vmatprep.subr.mxu0 %v2972_v46  ;;  %2364 = vmatprep.subr.mxu1 %v3924_v24 }
 0x347   :  { %1039 = vmatpush1.msra.mxu0 %v2975_v47  ;;  %2365 = vmatpush3.msra.mxu1 %v3085_v25 }
 0x348   :  { %1040 = vmatprep.subr.mxu0 %v2978_v48  ;;  %2366 = vmatprep.subr.mxu1 %v3924_v24 }
 0x349   :  { %1041 = vmatpush1.msra.mxu0 %v2982_v50  ;;  %2367 = vmatpush3.msra.mxu1 %v3101_v32 }
 0x34a   :  { %1042 = vmatprep.subr.mxu0 %v2986_v51  ;;  %2368 = vmatprep.subr.mxu1 %v3924_v24 }
 0x34b   :  { %1043 = vmatpush1.msra.mxu0 %v2989_v52  ;;  %2369 = vmatpush3.msra.mxu1 %v3110_v37 }
 0x34c   :  { %1044 = vmatprep.subr.mxu0 %v2992_v53  ;;  %2370 = vmatprep.subr.mxu1 %v3924_v24 }
 0x34d   :  { %1045 = vmatpush1.msra.mxu0 %v2996_v55  ;;  %2371 = vmatpush3.msra.mxu1 %v3116_v40 }
 0x34e   :  { %1046 = vmatprep.subr.mxu0 %v3000_v56  ;;  %2372 = vmatprep.subr.mxu1 %v3924_v24 }
 0x34f   :  { %1047 = vmatpush1.msra.mxu0 %v3003_v57  ;;  %2373 = vmatpush3.msra.mxu1 %v3121_v36 }
 0x350   :  { %1048 = vmatprep.subr.mxu0 %v3006_v58  ;;  %2374 = vmatprep.subr.mxu1 %v3924_v24 }
 0x351   :  { %1049 = vmatpush1.msra.mxu0 %v3010_v60  ;;  %2375 = vmatpush3.msra.mxu1 %v3128_v44 }
 0x352   :  { %1050 = vmatprep.subr.mxu0 %v3014_v61  ;;  %2376 = vmatprep.subr.mxu1 %v3924_v24 }
 0x353   :  { %1051 = vmatpush1.msra.mxu0 %v3017_v62  ;;  %2377 = vmatpush3.msra.mxu1 %v3133_v49 }
 0x354   :  { %1052 = vmatprep.subr.mxu0 %v3020_v63  ;;  %2378 = vmatprep.subr.mxu1 %v3924_v24 }
 0x355   :  { %1053 = vmatpush1.msra.mxu0 %v3024_v2  ;;  %2379 = vmatpush3.msra.mxu1 %v3138_v54 }
 0x356   :  { %1054 = vmatprep.subr.mxu0 %v3027_v3  ;;  %2380 = vmatprep.subr.mxu1 %v3924_v24 }
 0x357   :  { %1055 = vmatpush1.msra.mxu0 %v3030_v4  ;;  %2381 = vmatpush3.msra.mxu1 %v3143_v59 }
 0x358   :  { %1056 = vmatprep.subr.mxu0 %v3033_v5  ;;  %2382 = vmatprep.subr.mxu1 %v3924_v24 }
 0x359   :  { %1057 = vmatpush1.msra.mxu0 %v3036_v0  ;;  %2383 = vmatpush3.msra.mxu1 %v3148_v1 }
 0x35a   :  { %1058 = vmatprep.subr.mxu0 %v3039_v7  ;;  %2384 = vmatprep.subr.mxu1 %v3924_v24 }
 0x35b   :  { %1059 = vmatpush1.msra.mxu0 %v3042_v8  ;;  %2385 = vmatpush3.msra.mxu1 %v3153_v13 }
 0x35c   :  { %1060 = vmatprep.subr.mxu0 %v3045_v9  ;;  %2386 = vmatprep.subr.mxu1 %v3924_v24 }
 0x35d   :  { %1061 = vmatpush1.msra.mxu0 %v3048_v10  ;;  %2387 = vmatpush3.msra.mxu1 %v3931_v11  ;;  %v3938_v11 = vld [vmem:[#allocation34_spill] sm:$0xff] }
 0x35e   :  { %1062 = vmatprep.subr.mxu0 %v3932_v12  ;;  %2388 = vmatprep.subr.mxu1 %v3924_v24 }
 0x35f   :  { %1063 = vmatpush1.msra.mxu0 %v3933_v15  ;;  %1096 = vmatprep.mubr.f32.mxu0 %v3924_v24 }
 0x360   :  { %2389 = vmatpush3.msra.mxu1 %v3934_v21  ;;  %2390 = vmatprep.mubr.msk.f32.mxu1 %vm2865_vm4, %v3924_v24 }
 0x361   :  { %1205 = vmatprep.subr.mxu0 %v3935_v26  ;;  %2393 = vmatprep.subr.mxu1 %v3924_v24 }
 0x400   :  { %v925_v28 = vpop.f32.mrf.mxu0  ;;  %v996_v30 = vpop.f32.mrf.mxu1 }
 0x401   :  { %v1000_v38 = vadd.f32 %v925_v28, %v3936_v19  ;;  %v1014_v26 = vadd.f32 %v3276_v17, %v996_v30  ;;  %v3529_v30 = vld [vmem:[#allocation6 + $0x138] sm:$0xff] }
 0x402   :  { %v2357_v6 = vpop.f32.mrf.mxu1  ;;  %v927_v29 = vpop.f32.mrf.mxu0 }
 0x403   :  { %v2046_v23 = vmul.f32 -1.442695, %v1000_v38  ;;  %v1007_v35 = vadd.f32 %v927_v29, %v3937_v31 }
 0x405   :  { %2610 = vpow2.f32 %v2046_v23  ;;  %v2047_v18 = vmul.f32 -1.442695, %v1007_v35  ;;  %v3537_v35 = vld [vmem:[#allocation6 + $0x120] sm:$0xff] }
 0x407   :  { %2612 = vpow2.f32 %v2047_v18  ;;  %v3545_v18 = vld [vmem:[#allocation6 + $0x108] sm:$0xff] }
 0x412   :  { %v2611_v33 = vpop.eup %2610 }
 0x413   :  { %v1004_v34 = vadd.f32 1.0, %v2611_v33  ;;  %v3553_v33 = vld [vmem:[#allocation6 + $0xf0] sm:$0xff] }
 0x414   :  { %v2613_v27 = vpop.eup %2612 }
 0x415   :  { %2614 = vrcp.f32 %v1004_v34  ;;  %v1011_v21 = vadd.f32 1.0, %v2613_v27  ;;  %v3561_v34 = vld [vmem:[#allocation6 + $0xd8] sm:$0xff] }
 0x417   :  { %2616 = vrcp.f32 %v1011_v21  ;;  %v3525_v21 = vld [vmem:[#allocation6 + $0x140] sm:$0xff] }
 0x422   :  { %v2615_v15 = vpop.eup %2614 }
 0x423   :  { %v1015_v12 = vmul.f32 %v2615_v15, %v1014_v26  ;;  %v3521_v15 = vld [vmem:[#allocation6 + $0x150] sm:$0xff]  ;;  %v3569_v26 = vld [vmem:[#allocation6 + $0xc0] sm:$0xff] }
 0x424   :  { %v2617_v19 = vpop.eup %2616 }
 0x425   :  { %v1016_v28 = vadd.f32 %v1015_v12, %v3938_v11  ;;  %v1018_v38 = vsub.f32 1.0, %v2617_v19  ;;  %v1020_v29 = vmul.f32 %v2617_v19, %v3355_v22  ;;  %v3513_v11 = vld [vmem:[#allocation6 + $0x168] sm:$0xff]  ;;  %v3517_v12 = vld [vmem:[#allocation6 + $0x158] sm:$0xff]  ;;  %v3585_v19 = vld [vmem:[#allocation6 + $0x90] sm:$0xff] }
 0x427   :  { %2618 = vtanh.f32 %v1016_v28  ;;  %v3577_v28 = vld [vmem:[#allocation6 + $0xa8] sm:$0xff] }
 0x434   :  { %v2619_v6 = vpop.eup %2618 }
 0x435   :  { %v1019_v23 = vmul.f32 %v2619_v6, %v1018_v38  ;;  %v3593_v38 = vld [vmem:[#allocation6 + $0x78] sm:$0xff]  ;;  %v3601_v6 = vld [vmem:[#allocation6 + $0x60] sm:$0xff] }
 0x437   :  { %v3431_v31 = vadd.f32 %v1020_v29, %v1019_v23  ;;  %v3609_v23 = vld [vmem:[#allocation6 + $0x48] sm:$0xff]  ;;  %v3617_v29 = vld [vmem:[#allocation6 + $0x30] sm:$0xff] }
 0x439   :  { %3939 = vst [vmem:[#allocation23_spill] sm:$0xff] %v3431_v31  ;;  %1097 = vmatmul.mubr.f32.vlgmr.msra.gmra.mxu0 %v3431_v31  ;;  %2391 = vmatmul.mubr.f32.vlgmr.msra.gmra.mxu1 %v3431_v31 }
 0x43a   :  { %1206 = vmatpush1.msra.mxu0 %v2952_v39  ;;  %2394 = vmatpush3.msra.mxu1 %v3061_v14  ;;  %v3940_v39 = vld [vmem:[#allocation20_spill] sm:$0xff] }
 0x43b   :  { %1207 = vmatprep.subr.mxu0 %v2956_v41  ;;  %2395 = vmatprep.subr.mxu1 %v3924_v24  ;;  %v3941_v41 = vld [vmem:[#allocation18_spill] sm:$0xff] }
 0x43c   :  { %1208 = vmatpush1.msra.mxu0 %v2960_v42  ;;  %2396 = vmatpush3.msra.mxu1 %v3066_v16  ;;  %v3942_v42 = vld [vmem:[#allocation19_spill] sm:$0xff] }
 0x43d   :  { %1209 = vmatprep.subr.mxu0 %v2963_v43  ;;  %2397 = vmatprep.subr.mxu1 %v3924_v24  ;;  %v3943_v43 = vld [vmem:[#allocation21_spill] sm:$0xff] }
 0x43e   :  { %1210 = vmatpush1.msra.mxu0 %v2968_v45  ;;  %2398 = vmatpush3.msra.mxu1 %v3074_v20  ;;  %v3500_v45 = vld [vmem:[#allocation6 + $0x170] sm:$0xff] }
 0x43f   :  { %1211 = vmatprep.subr.mxu0 %v2972_v46  ;;  %2399 = vmatprep.subr.mxu1 %v3924_v24 }
 0x440   :  { %1212 = vmatpush1.msra.mxu0 %v2975_v47  ;;  %2400 = vmatpush3.msra.mxu1 %v3085_v25 }
 0x441   :  { %1213 = vmatprep.subr.mxu0 %v2978_v48  ;;  %2401 = vmatprep.subr.mxu1 %v3924_v24  ;;  %v3944_v48 = vld [vmem:[#allocation26_spill] sm:$0xff] }
 0x442   :  { %1214 = vmatpush1.msra.mxu0 %v2982_v50  ;;  %2402 = vmatpush3.msra.mxu1 %v3101_v32 }
 0x443   :  { %1215 = vmatprep.subr.mxu0 %v2986_v51  ;;  %2403 = vmatprep.subr.mxu1 %v3924_v24 }
 0x444   :  { %1216 = vmatpush1.msra.mxu0 %v2989_v52  ;;  %2404 = vmatpush3.msra.mxu1 %v3110_v37 }
 0x445   :  { %1217 = vmatprep.subr.mxu0 %v2992_v53  ;;  %2405 = vmatprep.subr.mxu1 %v3924_v24 }
 0x446   :  { %1218 = vmatpush1.msra.mxu0 %v2996_v55  ;;  %2406 = vmatpush3.msra.mxu1 %v3116_v40  ;;  %v3945_v55 = vld [vmem:[#allocation28_spill] sm:$0xff] }
 0x447   :  { %1219 = vmatprep.subr.mxu0 %v3000_v56  ;;  %2407 = vmatprep.subr.mxu1 %v3924_v24 }
 0x448   :  { %1220 = vmatpush1.msra.mxu0 %v3003_v57  ;;  %2408 = vmatpush3.msra.mxu1 %v3121_v36 }
 0x449   :  { %1221 = vmatprep.subr.mxu0 %v3006_v58  ;;  %2409 = vmatprep.subr.mxu1 %v3924_v24 }
 0x44a   :  { %1222 = vmatpush1.msra.mxu0 %v3010_v60  ;;  %2410 = vmatpush3.msra.mxu1 %v3128_v44 }
 0x44b   :  { %1223 = vmatprep.subr.mxu0 %v3014_v61  ;;  %2411 = vmatprep.subr.mxu1 %v3924_v24 }
 0x44c   :  { %1224 = vmatpush1.msra.mxu0 %v3017_v62  ;;  %2412 = vmatpush3.msra.mxu1 %v3133_v49 }
 0x44d   :  { %1225 = vmatprep.subr.mxu0 %v3020_v63  ;;  %2413 = vmatprep.subr.mxu1 %v3924_v24 }
 0x44e   :  { %1226 = vmatpush1.msra.mxu0 %v3024_v2  ;;  %2414 = vmatpush3.msra.mxu1 %v3138_v54 }
 0x44f   :  { %1227 = vmatprep.subr.mxu0 %v3027_v3  ;;  %2415 = vmatprep.subr.mxu1 %v3924_v24 }
 0x450   :  { %1228 = vmatpush1.msra.mxu0 %v3030_v4  ;;  %2416 = vmatpush3.msra.mxu1 %v3143_v59  ;;  %v3946_v4 = vld [vmem:[#allocation31_spill] sm:$0xff] }
 0x451   :  { %1229 = vmatprep.subr.mxu0 %v3033_v5  ;;  %2417 = vmatprep.subr.mxu1 %v3924_v24 }
 0x452   :  { %1230 = vmatpush1.msra.mxu0 %v3036_v0  ;;  %2418 = vmatpush3.msra.mxu1 %v3148_v1 }
 0x453   :  { %1231 = vmatprep.subr.mxu0 %v3039_v7  ;;  %2419 = vmatprep.subr.mxu1 %v3924_v24 }
 0x454   :  { %1232 = vmatpush1.msra.mxu0 %v3042_v8  ;;  %2420 = vmatpush3.msra.mxu1 %v3153_v13 }
 0x455   :  { %1233 = vmatprep.subr.mxu0 %v3045_v9  ;;  %2421 = vmatprep.subr.mxu1 %v3924_v24 }
 0x456   :  { %1234 = vmatpush1.msra.mxu0 %v3048_v10  ;;  %2422 = vmatpush3.msra.mxu1 %v3940_v39 }
 0x457   :  { %1235 = vmatprep.subr.mxu0 %v3941_v41  ;;  %2423 = vmatprep.subr.mxu1 %v3924_v24  ;;  %v3625_v41 = vld [vmem:[#allocation6 + $0x18] sm:$0xff] }
 0x458   :  { %1236 = vmatpush1.msra.mxu0 %v3942_v42  ;;  %1269 = vmatprep.mubr.f32.mxu0 %v3924_v24  ;;  %v3633_v42 = vld [vmem:[#allocation6] sm:$0xff] }
 0x459   :  { %2424 = vmatpush3.msra.mxu1 %v3943_v43  ;;  %2425 = vmatprep.mubr.msk.f32.mxu1 %vm2865_vm4, %v3924_v24  ;;  %3949 = vst [vmem:[#allocation24_spill] sm:$0xff] %v3633_v42 }
 0x45a   :  { %1378 = vmatprep.subr.mxu0 %v3500_v45  ;;  %2428 = vmatprep.subr.mxu1 %v3924_v24 }
 0x4f9   :  { %v1098_v46 = vpop.f32.mrf.mxu0  ;;  %v1169_v47 = vpop.f32.mrf.mxu1 }
 0x4fa   :  { %v1173_v50 = vadd.f32 %v1098_v46, %v3944_v48  ;;  %v1187_v63 = vadd.f32 %v3276_v17, %v1169_v47  ;;  %v3950_v46 = vld [vmem:[#allocation29_spill] sm:$0xff] }
 0x4fb   :  { %v2392_v51 = vpop.f32.mrf.mxu1  ;;  %v1100_v53 = vpop.f32.mrf.mxu0 }
 0x4fc   :  { %v2048_v52 = vmul.f32 -1.442695, %v1173_v50  ;;  %v1180_v56 = vadd.f32 %v1100_v53, %v3945_v55 }
 0x4fe   :  { %2620 = vpow2.f32 %v2048_v52  ;;  %v2049_v57 = vmul.f32 -1.442695, %v1180_v56  ;;  %v3951_v52 = vld [vmem:[#allocation30_spill] sm:$0xff] }
 0x500   :  { %2622 = vpow2.f32 %v2049_v57 }
 0x50b   :  { %v2621_v58 = vpop.eup %2620 }
 0x50c   :  { %v1177_v60 = vadd.f32 1.0, %v2621_v58 }
 0x50d   :  { %v2623_v61 = vpop.eup %2622 }
 0x50e   :  { %2624 = vrcp.f32 %v1177_v60  ;;  %v1184_v62 = vadd.f32 1.0, %v2623_v61 }
 0x510   :  { %2626 = vrcp.f32 %v1184_v62 }
 0x51b   :  { %v2625_v2 = vpop.eup %2624 }
 0x51c   :  { %v1188_v3 = vmul.f32 %v2625_v2, %v1187_v63  ;;  %v3952_v63 = vld [vmem:[#allocation40_spill] sm:$0xff] }
 0x51d   :  { %v2627_v0 = vpop.eup %2626 }
 0x51e   :  { %v1189_v5 = vadd.f32 %v3946_v4, %v1188_v3  ;;  %v1191_v7 = vsub.f32 1.0, %v2627_v0  ;;  %v1193_v10 = vmul.f32 %v2627_v0, %v3431_v31 }
 0x520   :  { %2628 = vtanh.f32 %v1189_v5 }
 0x52d   :  { %v2629_v8 = vpop.eup %2628 }
 0x52e   :  { %v1192_v9 = vmul.f32 %v2629_v8, %v1191_v7 }
 0x530   :  { %v3509_v27 = vadd.f32 %v1193_v10, %v1192_v9  ;;  %v3652_v9 = vld [vmem:[#allocation6 + $0x178] sm:$0xff]  ;;  %v3658_v10 = vld [vmem:[#allocation6 + $0x160] sm:$0xff] }
 0x532   :  { %3947 = vst [vmem:[#allocation27_spill] sm:$0xff] %v3509_v27  ;;  %1270 = vmatmul.mubr.f32.vlgmr.msra.gmra.mxu0 %v3509_v27  ;;  %2426 = vmatmul.mubr.f32.vlgmr.msra.gmra.mxu1 %v3509_v27 }
 0x533   :  { %1379 = vmatpush1.msra.mxu0 %v3513_v11  ;;  %2429 = vmatpush3.msra.mxu1 %v3061_v14  ;;  %v3533_v14 = vld [vmem:[#allocation6 + $0x128] sm:$0xff] }
 0x534   :  { %1380 = vmatprep.subr.mxu0 %v3517_v12  ;;  %2430 = vmatprep.subr.mxu1 %v3924_v24 }
 0x535   :  { %1381 = vmatpush1.msra.mxu0 %v3521_v15  ;;  %2431 = vmatpush3.msra.mxu1 %v3066_v16  ;;  %v3541_v16 = vld [vmem:[#allocation6 + $0x110] sm:$0xff] }
 0x536   :  { %1382 = vmatprep.subr.mxu0 %v3525_v21  ;;  %2432 = vmatprep.subr.mxu1 %v3924_v24 }
 0x537   :  { %1383 = vmatpush1.msra.mxu0 %v3529_v30  ;;  %2433 = vmatpush3.msra.mxu1 %v3074_v20  ;;  %v3549_v20 = vld [vmem:[#allocation6 + $0xf8] sm:$0xff] }
 0x538   :  { %1384 = vmatprep.subr.mxu0 %v3533_v14  ;;  %2434 = vmatprep.subr.mxu1 %v3924_v24 }
 0x539   :  { %1385 = vmatpush1.msra.mxu0 %v3537_v35  ;;  %2435 = vmatpush3.msra.mxu1 %v3085_v25  ;;  %v3557_v25 = vld [vmem:[#allocation6 + $0xe0] sm:$0xff] }
 0x53a   :  { %1386 = vmatprep.subr.mxu0 %v3541_v16  ;;  %2436 = vmatprep.subr.mxu1 %v3924_v24 }
 0x53b   :  { %1387 = vmatpush1.msra.mxu0 %v3545_v18  ;;  %2437 = vmatpush3.msra.mxu1 %v3101_v32  ;;  %v3565_v32 = vld [vmem:[#allocation6 + $0xc8] sm:$0xff] }
 0x53c   :  { %1388 = vmatprep.subr.mxu0 %v3549_v20  ;;  %2438 = vmatprep.subr.mxu1 %v3924_v24 }
 0x53d   :  { %1389 = vmatpush1.msra.mxu0 %v3553_v33  ;;  %2439 = vmatpush3.msra.mxu1 %v3110_v37  ;;  %v3573_v37 = vld [vmem:[#allocation6 + $0xb0] sm:$0xff] }
 0x53e   :  { %1390 = vmatprep.subr.mxu0 %v3557_v25  ;;  %2440 = vmatprep.subr.mxu1 %v3924_v24 }
 0x53f   :  { %1391 = vmatpush1.msra.mxu0 %v3561_v34  ;;  %2441 = vmatpush3.msra.mxu1 %v3116_v40  ;;  %v3581_v40 = vld [vmem:[#allocation6 + $0x98] sm:$0xff] }
 0x540   :  { %1392 = vmatprep.subr.mxu0 %v3565_v32  ;;  %2442 = vmatprep.subr.mxu1 %v3924_v24 }
 0x541   :  { %1393 = vmatpush1.msra.mxu0 %v3569_v26  ;;  %2443 = vmatpush3.msra.mxu1 %v3121_v36  ;;  %v3589_v36 = vld [vmem:[#allocation6 + $0x80] sm:$0xff] }
 0x542   :  { %1394 = vmatprep.subr.mxu0 %v3573_v37  ;;  %2444 = vmatprep.subr.mxu1 %v3924_v24 }
 0x543   :  { %1395 = vmatpush1.msra.mxu0 %v3577_v28  ;;  %2445 = vmatpush3.msra.mxu1 %v3128_v44  ;;  %v3597_v44 = vld [vmem:[#allocation6 + $0x68] sm:$0xff] }
 0x544   :  { %1396 = vmatprep.subr.mxu0 %v3581_v40  ;;  %2446 = vmatprep.subr.mxu1 %v3924_v24 }
 0x545   :  { %1397 = vmatpush1.msra.mxu0 %v3585_v19  ;;  %2447 = vmatpush3.msra.mxu1 %v3133_v49  ;;  %v3605_v49 = vld [vmem:[#allocation6 + $0x50] sm:$0xff] }
 0x546   :  { %1398 = vmatprep.subr.mxu0 %v3589_v36  ;;  %2448 = vmatprep.subr.mxu1 %v3924_v24 }
 0x547   :  { %1399 = vmatpush1.msra.mxu0 %v3593_v38  ;;  %2449 = vmatpush3.msra.mxu1 %v3138_v54  ;;  %v3613_v54 = vld [vmem:[#allocation6 + $0x38] sm:$0xff] }
 0x548   :  { %1400 = vmatprep.subr.mxu0 %v3597_v44  ;;  %2450 = vmatprep.subr.mxu1 %v3924_v24 }
 0x549   :  { %1401 = vmatpush1.msra.mxu0 %v3601_v6  ;;  %2451 = vmatpush3.msra.mxu1 %v3143_v59  ;;  %v3621_v59 = vld [vmem:[#allocation6 + $0x20] sm:$0xff] }
 0x54a   :  { %1402 = vmatprep.subr.mxu0 %v3605_v49  ;;  %2452 = vmatprep.subr.mxu1 %v3924_v24 }
 0x54b   :  { %1403 = vmatpush1.msra.mxu0 %v3609_v23  ;;  %2453 = vmatpush3.msra.mxu1 %v3148_v1  ;;  %v3629_v1 = vld [vmem:[#allocation6 + $0x8] sm:$0xff] }
 0x54c   :  { %1404 = vmatprep.subr.mxu0 %v3613_v54  ;;  %2454 = vmatprep.subr.mxu1 %v3924_v24  ;;  %3948 = vst [vmem:[#allocation17_spill] sm:$0xff] %v3629_v1 }
 0x54d   :  { %1405 = vmatpush1.msra.mxu0 %v3617_v29  ;;  %2455 = vmatpush3.msra.mxu1 %v3153_v13 }
 0x54e   :  { %1406 = vmatprep.subr.mxu0 %v3621_v59  ;;  %2456 = vmatprep.subr.mxu1 %v3924_v24 }
 0x54f   :  { %1407 = vmatpush1.msra.mxu0 %v3625_v41  ;;  %2457 = vmatpush3.msra.mxu1 %v3940_v39 }
 0x550   :  { %1408 = vmatprep.subr.mxu0 %v3629_v1  ;;  %2458 = vmatprep.subr.mxu1 %v3924_v24 }
 0x551   :  { %1409 = vmatpush1.msra.mxu0 %v3633_v42  ;;  %1442 = vmatprep.mubr.f32.mxu0 %v3924_v24 }
 0x552   :  { %2459 = vmatpush3.msra.mxu1 %v3943_v43  ;;  %2460 = vmatprep.mubr.msk.f32.mxu1 %vm2865_vm4, %v3924_v24 }
 0x553   :  { %1551 = vmatprep.subr.mxu0 %v3500_v45  ;;  %2463 = vmatprep.subr.mxu1 %v3924_v24 }
 0x5f2   :  { %v1271_v13 = vpop.f32.mrf.mxu0  ;;  %v1342_v39 = vpop.f32.mrf.mxu1 }
 0x5f3   :  { %v1346_v47 = vadd.f32 %v1271_v13, %v3950_v46  ;;  %v1360_v60 = vadd.f32 %v3276_v17, %v1342_v39  ;;  %v3664_v13 = vld [vmem:[#allocation6 + $0x148] sm:$0xff]  ;;  %v3670_v39 = vld [vmem:[#allocation6 + $0x130] sm:$0xff]  ;;  %v3676_v46 = vld [vmem:[#allocation6 + $0x118] sm:$0xff] }
 0x5f4   :  { %v2427_v48 = vpop.f32.mrf.mxu1  ;;  %v1273_v51 = vpop.f32.mrf.mxu0 }
 0x5f5   :  { %v2050_v50 = vmul.f32 -1.442695, %v1346_v47  ;;  %v1353_v53 = vadd.f32 %v1273_v51, %v3951_v52  ;;  %v3682_v47 = vld [vmem:[#allocation6 + $0x100] sm:$0xff]  ;;  %v3688_v48 = vld [vmem:[#allocation6 + $0xe8] sm:$0xff]  ;;  %v3700_v51 = vld [vmem:[#allocation6 + $0xb8] sm:$0xff] }
 0x5f6   :  { %v3706_v52 = vld [vmem:[#allocation6 + $0xa0] sm:$0xff] }
 0x5f7   :  { %2630 = vpow2.f32 %v2050_v50  ;;  %v2051_v55 = vmul.f32 -1.442695, %v1353_v53  ;;  %v3694_v50 = vld [vmem:[#allocation6 + $0xd0] sm:$0xff]  ;;  %v3712_v53 = vld [vmem:[#allocation6 + $0x88] sm:$0xff] }
 0x5f9   :  { %2632 = vpow2.f32 %v2051_v55  ;;  %v3718_v55 = vld [vmem:[#allocation6 + $0x70] sm:$0xff] }
 0x604   :  { %v2631_v43 = vpop.eup %2630 }
 0x605   :  { %v1350_v56 = vadd.f32 1.0, %v2631_v43  ;;  %v3724_v43 = vld [vmem:[#allocation6 + $0x58] sm:$0xff] }
 0x606   :  { %v2633_v57 = vpop.eup %2632 }
 0x607   :  { %2634 = vrcp.f32 %v1350_v56  ;;  %v1357_v58 = vadd.f32 1.0, %v2633_v57  ;;  %v3730_v56 = vld [vmem:[#allocation6 + $0x40] sm:$0xff]  ;;  %v3736_v57 = vld [vmem:[#allocation6 + $0x28] sm:$0xff] }
 0x608   :  { %3953 = vst [vmem:[#allocation25_spill] sm:$0xff] %v3736_v57 }
 0x609   :  { %2636 = vrcp.f32 %v1357_v58  ;;  %v3743_v58 = vld [vmem:[#allocation6 + $0x10] sm:$0xff] }
 0x60a   :  { %3954 = vst [vmem:[#allocation34_spill] sm:$0xff] %v3743_v58 }
 0x614   :  { %v2635_v61 = vpop.eup %2634 }
 0x615   :  { %v1361_v62 = vmul.f32 %v2635_v61, %v1360_v60 }
 0x616   :  { %v2637_v3 = vpop.eup %2636 }
 0x617   :  { %v1362_v2 = vadd.f32 %v1361_v62, %v3952_v63  ;;  %v1364_v4 = vsub.f32 1.0, %v2637_v3  ;;  %v1366_v7 = vmul.f32 %v2637_v3, %v3509_v27  ;;  %v3955_v62 = vld [vmem:[#allocation32_spill] sm:$0xff] }
 0x619   :  { %2638 = vtanh.f32 %v1362_v2 }
 0x626   :  { %v2639_v5 = vpop.eup %2638 }
 0x627   :  { %v1365_v0 = vmul.f32 %v2639_v5, %v1364_v4  ;;  %v3956_v5 = vld [vmem:[#allocation33_spill] sm:$0xff] }
 0x629   :  { %v3647_v8 = vadd.f32 %v1366_v7, %v1365_v0 }
 0x62b   :  { %1443 = vmatmul.mubr.f32.vlgmr.msra.gmra.mxu0 %v3647_v8  ;;  %2461 = vmatmul.mubr.f32.vlgmr.msra.gmra.mxu1 %v3647_v8 }
 0x62c   :  { %1552 = vmatpush1.msra.mxu0 %v3513_v11  ;;  %2464 = vmatpush3.msra.mxu1 %v3652_v9 }
 0x62d   :  { %1553 = vmatprep.subr.mxu0 %v3517_v12  ;;  %2465 = vmatprep.subr.mxu1 %v3924_v24 }
 0x62e   :  { %1554 = vmatpush1.msra.mxu0 %v3521_v15  ;;  %2466 = vmatpush3.msra.mxu1 %v3658_v10 }
 0x62f   :  { %1555 = vmatprep.subr.mxu0 %v3525_v21  ;;  %2467 = vmatprep.subr.mxu1 %v3924_v24 }
 0x630   :  { %1556 = vmatpush1.msra.mxu0 %v3529_v30  ;;  %2468 = vmatpush3.msra.mxu1 %v3664_v13 }
 0x631   :  { %1557 = vmatprep.subr.mxu0 %v3533_v14  ;;  %2469 = vmatprep.subr.mxu1 %v3924_v24 }
 0x632   :  { %1558 = vmatpush1.msra.mxu0 %v3537_v35  ;;  %2470 = vmatpush3.msra.mxu1 %v3670_v39 }
 0x633   :  { %1559 = vmatprep.subr.mxu0 %v3541_v16  ;;  %2471 = vmatprep.subr.mxu1 %v3924_v24 }
 0x634   :  { %1560 = vmatpush1.msra.mxu0 %v3545_v18  ;;  %2472 = vmatpush3.msra.mxu1 %v3676_v46 }
 0x635   :  { %1561 = vmatprep.subr.mxu0 %v3549_v20  ;;  %2473 = vmatprep.subr.mxu1 %v3924_v24 }
 0x636   :  { %1562 = vmatpush1.msra.mxu0 %v3553_v33  ;;  %2474 = vmatpush3.msra.mxu1 %v3682_v47 }
 0x637   :  { %1563 = vmatprep.subr.mxu0 %v3557_v25  ;;  %2475 = vmatprep.subr.mxu1 %v3924_v24 }
 0x638   :  { %1564 = vmatpush1.msra.mxu0 %v3561_v34  ;;  %2476 = vmatpush3.msra.mxu1 %v3688_v48 }
 0x639   :  { %1565 = vmatprep.subr.mxu0 %v3565_v32  ;;  %2477 = vmatprep.subr.mxu1 %v3924_v24 }
 0x63a   :  { %1566 = vmatpush1.msra.mxu0 %v3569_v26  ;;  %2478 = vmatpush3.msra.mxu1 %v3694_v50 }
 0x63b   :  { %1567 = vmatprep.subr.mxu0 %v3573_v37  ;;  %2479 = vmatprep.subr.mxu1 %v3924_v24 }
 0x63c   :  { %1568 = vmatpush1.msra.mxu0 %v3577_v28  ;;  %2480 = vmatpush3.msra.mxu1 %v3700_v51 }
 0x63d   :  { %1569 = vmatprep.subr.mxu0 %v3581_v40  ;;  %2481 = vmatprep.subr.mxu1 %v3924_v24 }
 0x63e   :  { %1570 = vmatpush1.msra.mxu0 %v3585_v19  ;;  %2482 = vmatpush3.msra.mxu1 %v3706_v52 }
 0x63f   :  { %1571 = vmatprep.subr.mxu0 %v3589_v36  ;;  %2483 = vmatprep.subr.mxu1 %v3924_v24 }
 0x640   :  { %1572 = vmatpush1.msra.mxu0 %v3593_v38  ;;  %2484 = vmatpush3.msra.mxu1 %v3712_v53 }
 0x641   :  { %1573 = vmatprep.subr.mxu0 %v3597_v44  ;;  %2485 = vmatprep.subr.mxu1 %v3924_v24 }
 0x642   :  { %1574 = vmatpush1.msra.mxu0 %v3601_v6  ;;  %2486 = vmatpush3.msra.mxu1 %v3718_v55 }
 0x643   :  { %1575 = vmatprep.subr.mxu0 %v3605_v49  ;;  %2487 = vmatprep.subr.mxu1 %v3924_v24 }
 0x644   :  { %1576 = vmatpush1.msra.mxu0 %v3609_v23  ;;  %2488 = vmatpush3.msra.mxu1 %v3724_v43 }
 0x645   :  { %1577 = vmatprep.subr.mxu0 %v3613_v54  ;;  %2489 = vmatprep.subr.mxu1 %v3924_v24 }
 0x646   :  { %1578 = vmatpush1.msra.mxu0 %v3617_v29  ;;  %2490 = vmatpush3.msra.mxu1 %v3730_v56 }
 0x647   :  { %1579 = vmatprep.subr.mxu0 %v3621_v59  ;;  %2491 = vmatprep.subr.mxu1 %v3924_v24 }
 0x648   :  { %1580 = vmatpush1.msra.mxu0 %v3625_v41  ;;  %2492 = vmatpush3.msra.mxu1 %v3736_v57  ;;  %v3957_v57 = vld [vmem:[#allocation37_spill] sm:$0xff] }
 0x649   :  { %1581 = vmatprep.subr.mxu0 %v3629_v1  ;;  %2493 = vmatprep.subr.mxu1 %v3924_v24 }
 0x64a   :  { %1582 = vmatpush1.msra.mxu0 %v3633_v42  ;;  %1615 = vmatprep.mubr.f32.mxu0 %v3924_v24 }
 0x64b   :  { %2494 = vmatpush3.msra.mxu1 %v3743_v58  ;;  %2495 = vmatprep.mubr.msk.f32.mxu1 %vm2865_vm4, %v3924_v24 }
 0x64c   :  { %1724 = vmatprep.subr.mxu0 %v3500_v45  ;;  %2498 = vmatprep.subr.mxu1 %v3924_v24 }
 0x6eb   :  { %v1444_v60 = vpop.f32.mrf.mxu0  ;;  %v1515_v61 = vpop.f32.mrf.mxu1 }
 0x6ec   :  { %v1519_v63 = vadd.f32 %v1444_v60, %v3955_v62  ;;  %v1533_v45 = vadd.f32 %v3276_v17, %v1515_v61  ;;  %v3958_v17 = vld [vmem:[#allocation25_spill] sm:$0xff] }
 0x6ed   :  { %v2462_v2 = vpop.f32.mrf.mxu1  ;;  %v1446_v4 = vpop.f32.mrf.mxu0 }
 0x6ee   :  { %v2052_v3 = vmul.f32 -1.442695, %v1519_v63  ;;  %v1526_v0 = vadd.f32 %v1446_v4, %v3956_v5 }
 0x6f0   :  { %2640 = vpow2.f32 %v2052_v3  ;;  %v2053_v7 = vmul.f32 -1.442695, %v1526_v0 }
 0x6f2   :  { %2642 = vpow2.f32 %v2053_v7  ;;  %v3966_v7 = vld [vmem:[#allocation39_spill] sm:$0xff] }
 0x6fd   :  { %v2641_v27 = vpop.eup %2640 }
 0x6fe   :  { %v1523_v31 = vadd.f32 1.0, %v2641_v27  ;;  %v3961_v27 = vld [vmem:[#allocation34_spill] sm:$0xff] }
 0x6ff   :  { %v2643_v22 = vpop.eup %2642 }
 0x700   :  { %2644 = vrcp.f32 %v1523_v31  ;;  %v1530_v58 = vadd.f32 1.0, %v2643_v22  ;;  %v3959_v22 = vld [vmem:[#allocation17_spill] sm:$0xff]  ;;  %v3960_v31 = vld [vmem:[#allocation24_spill] sm:$0xff] }
 0x702   :  { %2646 = vrcp.f32 %v1530_v58 }
 0x70d   :  { %v2645_v42 = vpop.eup %2644 }
 0x70e   :  { %v1534_v1 = vmul.f32 %v2645_v42, %v1533_v45  ;;  %v1916_v42 = vld [vmem:[#allocation9 + $0x58] sm:$0xff] }
 0x70f   :  { %v2647_v62 = vpop.eup %2646 }
 0x710   :  { %v1535_v60 = vadd.f32 %v3957_v57, %v1534_v1  ;;  %v1537_v63 = vsub.f32 1.0, %v2647_v62  ;;  %v1539_v4 = vmul.f32 %v2647_v62, %v3647_v8  ;;  %v1917_v1 = vld [vmem:[#allocation9 + $0x60] sm:$0xff]  ;;  %v680_v62 = vpop.permute.xlu1 %679 }
 0x711   :  { %vm681_vm3 = vcmp.eq.s32.totalorder %v680_v62, 1 }
 0x712   :  { %2648 = vtanh.f32 %v1535_v60 }
 0x71f   :  { %v2649_v2 = vpop.eup %2648 }
 0x720   :  { %v1538_v3 = vmul.f32 %v2649_v2, %v1537_v63 }
 0x722   :  { %v3755_v5 = vadd.f32 %v1539_v4, %v1538_v3  ;;  %v1026_v3 = vpop.permute.xlu1 %1025 }
 0x723   :  { %vm1027_vm6 = vcmp.eq.s32.totalorder %v1026_v3, 1 }
 0x724   :  { %1616 = vmatmul.mubr.f32.vlgmr.msra.gmra.mxu0 %v3755_v5  ;;  %2496 = vmatmul.mubr.f32.vlgmr.msra.gmra.mxu1 %v3755_v5 }
 0x725   :  { %1725 = vmatpush1.msra.mxu0 %v3513_v11  ;;  %2499 = vmatpush3.msra.mxu1 %v3652_v9  ;;  %v1915_v9 = vld [vmem:[#allocation9 + $0x50] sm:$0xff] }
 0x726   :  { %1726 = vmatprep.subr.mxu0 %v3517_v12  ;;  %2500 = vmatprep.subr.mxu1 %v3924_v24 }
 0x727   :  { %1727 = vmatpush1.msra.mxu0 %v3521_v15  ;;  %2501 = vmatpush3.msra.mxu1 %v3658_v10  ;;  %v3962_v15 = vld [vmem:[#allocation35_spill] sm:$0xff]  ;;  %v1914_v10 = vld [vmem:[#allocation9 + $0x48] sm:$0xff] }
 0x728   :  { %1728 = vmatprep.subr.mxu0 %v3525_v21  ;;  %2502 = vmatprep.subr.mxu1 %v3924_v24 }
 0x729   :  { %1729 = vmatpush1.msra.mxu0 %v3529_v30  ;;  %2503 = vmatpush3.msra.mxu1 %v3664_v13  ;;  %v1913_v13 = vld [vmem:[#allocation9 + $0x40] sm:$0xff] }
 0x72a   :  { %1730 = vmatprep.subr.mxu0 %v3533_v14  ;;  %2504 = vmatprep.subr.mxu1 %v3924_v24 }
 0x72b   :  { %1731 = vmatpush1.msra.mxu0 %v3537_v35  ;;  %2505 = vmatpush3.msra.mxu1 %v3670_v39  ;;  %v1912_v39 = vld [vmem:[#allocation9 + $0x38] sm:$0xff] }
 0x72c   :  { %1732 = vmatprep.subr.mxu0 %v3541_v16  ;;  %2506 = vmatprep.subr.mxu1 %v3924_v24  ;;  %v3963_v16 = vld [vmem:[#allocation36_spill] sm:$0xff] }
 0x72d   :  { %1733 = vmatpush1.msra.mxu0 %v3545_v18  ;;  %2507 = vmatpush3.msra.mxu1 %v3676_v46  ;;  %v1911_v46 = vld [vmem:[#allocation9 + $0x30] sm:$0xff] }
 0x72e   :  { %1734 = vmatprep.subr.mxu0 %v3549_v20  ;;  %2508 = vmatprep.subr.mxu1 %v3924_v24 }
 0x72f   :  { %1735 = vmatpush1.msra.mxu0 %v3553_v33  ;;  %2509 = vmatpush3.msra.mxu1 %v3682_v47  ;;  %v1910_v47 = vld [vmem:[#allocation9 + $0x28] sm:$0xff] }
 0x730   :  { %1736 = vmatprep.subr.mxu0 %v3557_v25  ;;  %2510 = vmatprep.subr.mxu1 %v3924_v24 }
 0x731   :  { %1737 = vmatpush1.msra.mxu0 %v3561_v34  ;;  %2511 = vmatpush3.msra.mxu1 %v3688_v48  ;;  %v1909_v48 = vld [vmem:[#allocation9 + $0x20] sm:$0xff] }
 0x732   :  { %1738 = vmatprep.subr.mxu0 %v3565_v32  ;;  %2512 = vmatprep.subr.mxu1 %v3924_v24 }
 0x733   :  { %1739 = vmatpush1.msra.mxu0 %v3569_v26  ;;  %2513 = vmatpush3.msra.mxu1 %v3694_v50  ;;  %v3827_v26 = vld [vmem:[#allocation8] ss:$0 sm:$0xff] }
 0x734   :  { %1740 = vmatprep.subr.mxu0 %v3573_v37  ;;  %2514 = vmatprep.subr.mxu1 %v3924_v24  ;;  %v1908_v50 = vld [vmem:[#allocation9 + $0x18] sm:$0xff] }
 0x735   :  { %1741 = vmatpush1.msra.mxu0 %v3577_v28  ;;  %2515 = vmatpush3.msra.mxu1 %v3700_v51  ;;  %v1907_v51 = vld [vmem:[#allocation9 + $0x10] sm:$0xff] }
 0x736   :  { %1742 = vmatprep.subr.mxu0 %v3581_v40  ;;  %2516 = vmatprep.subr.mxu1 %v3924_v24 }
 0x737   :  { %1743 = vmatpush1.msra.mxu0 %v3585_v19  ;;  %2517 = vmatpush3.msra.mxu1 %v3706_v52  ;;  %v3964_v19 = vld [vmem:[#allocation42_spill] sm:$0xff]  ;;  %v1906_v52 = vld [vmem:[#allocation9 + $0x8] sm:$0xff] }
 0x738   :  { %1744 = vmatprep.subr.mxu0 %v3589_v36  ;;  %2518 = vmatprep.subr.mxu1 %v3924_v24 }
 0x739   :  { %1745 = vmatpush1.msra.mxu0 %v3593_v38  ;;  %2519 = vmatpush3.msra.mxu1 %v3712_v53  ;;  %v1905_v53 = vld [vmem:[#allocation9] sm:$0xff] }
 0x73a   :  { %1746 = vmatprep.subr.mxu0 %v3597_v44  ;;  %2520 = vmatprep.subr.mxu1 %v3924_v24 }
 0x73b   :  { %1747 = vmatpush1.msra.mxu0 %v3601_v6  ;;  %2521 = vmatpush3.msra.mxu1 %v3718_v55 }
 0x73c   :  { %1748 = vmatprep.subr.mxu0 %v3605_v49  ;;  %2522 = vmatprep.subr.mxu1 %v3924_v24 }
 0x73d   :  { %1749 = vmatpush1.msra.mxu0 %v3609_v23  ;;  %2523 = vmatpush3.msra.mxu1 %v3724_v43 }
 0x73e   :  { %1750 = vmatprep.subr.mxu0 %v3613_v54  ;;  %2524 = vmatprep.subr.mxu1 %v3924_v24 }
 0x73f   :  { %1751 = vmatpush1.msra.mxu0 %v3617_v29  ;;  %2525 = vmatpush3.msra.mxu1 %v3730_v56  ;;  %v1920_v29 = vld [vmem:[#allocation9 + $0x78] sm:$0xff] }
 0x740   :  { %1752 = vmatprep.subr.mxu0 %v3621_v59  ;;  %2526 = vmatprep.subr.mxu1 %v3924_v24  ;;  %v1919_v59 = vld [vmem:[#allocation9 + $0x70] sm:$0xff] }
 0x741   :  { %1753 = vmatpush1.msra.mxu0 %v3625_v41  ;;  %2527 = vmatpush3.msra.mxu1 %v3958_v17  ;;  %v1918_v41 = vld [vmem:[#allocation9 + $0x68] sm:$0xff]  ;;  %v3965_v56 = vld [vmem:[#allocation38_spill] sm:$0xff] }
 0x742   :  { %1754 = vmatprep.subr.mxu0 %v3959_v22  ;;  %2528 = vmatprep.subr.mxu1 %v3924_v24 }
 0x743   :  { %1755 = vmatpush1.msra.mxu0 %v3960_v31  ;;  %1788 = vmatprep.mubr.f32.mxu0 %v3924_v24 }
 0x744   :  { %2529 = vmatpush3.msra.mxu1 %v3961_v27  ;;  %2530 = vmatprep.mubr.msk.f32.mxu1 %vm2865_vm4, %v3924_v24 }
 0x745   :  { %2533 = vmatprep.subr.mxu0 %v3924_v24 }
 0x7e4   :  { %v1617_v11 = vpop.f32.mrf.mxu0  ;;  %v1688_v12 = vpop.f32.mrf.mxu1 }
 0x7e5   :  { %v1692_v21 = vadd.f32 %v1617_v11, %v3962_v15  ;;  %v1706_v37 = vadd.f32 %v3827_v26, %v1688_v12  ;;  %v3967_v12 = vld [vmem:[#allocation41_spill] sm:$0xff] }
 0x7e6   :  { %v2497_v30 = vpop.f32.mrf.mxu1  ;;  %v1619_v35 = vpop.f32.mrf.mxu0 }
 0x7e7   :  { %v2054_v14 = vmul.f32 -1.442695, %v1692_v21  ;;  %v1699_v18 = vadd.f32 %v1619_v35, %v3963_v16  ;;  %v853_v30 = vpop.permute.xlu0 %852  ;;  %v3968_v16 = vld [vmem:[#allocation43_spill] sm:$0xff] }
 0x7e8   :  { %vm854_vm5 = vcmp.eq.s32.totalorder %v853_v30, 1 }
 0x7e9   :  { %2650 = vpow2.f32 %v2054_v14  ;;  %v2055_v20 = vmul.f32 -1.442695, %v1699_v18  ;;  %v682_v18 = vsel %vm681_vm3, %v3968_v16, 0.0 }
 0x7eb   :  { %2652 = vpow2.f32 %v2055_v20  ;;  %v3969_v20 = vld [vmem:[#allocation22_spill] sm:$0xff] }
 0x7f6   :  { %v2651_v33 = vpop.eup %2650 }
 0x7f7   :  { %v1696_v25 = vadd.f32 1.0, %v2651_v33  ;;  %v855_v33 = vsel %vm854_vm5, %v3969_v20, %v682_v18 }
 0x7f8   :  { %v2653_v34 = vpop.eup %2652 }
 0x7f9   :  { %2654 = vrcp.f32 %v1696_v25  ;;  %v1703_v32 = vadd.f32 1.0, %v2653_v34 }
 0x7fb   :  { %2656 = vrcp.f32 %v1703_v32  ;;  %v3970_v32 = vld [vmem:[#allocation23_spill] sm:$0xff] }
 0x806   :  { %v2655_v28 = vpop.eup %2654 }
 0x807   :  { %v1707_v40 = vmul.f32 %v2655_v28, %v1706_v37  ;;  %v3971_v28 = vld [vmem:[#allocation27_spill] sm:$0xff] }
 0x808   :  { %v2657_v38 = vpop.eup %2656 }
 0x809   :  { %v1708_v36 = vadd.f32 %v1707_v40, %v3964_v19  ;;  %v1710_v44 = vsub.f32 1.0, %v2657_v38  ;;  %v1712_v23 = vmul.f32 %v2657_v38, %v3755_v5 }
 0x80b   :  { %2658 = vtanh.f32 %v1708_v36 }
 0x818   :  { %v2659_v6 = vpop.eup %2658 }
 0x819   :  { %v1711_v49 = vmul.f32 %v2659_v6, %v1710_v44 }
 0x81b   :  { %v3832_v54 = vadd.f32 %v1712_v23, %v1711_v49  ;;  %v1903_v23 = vpop.xlane.xlu0 %1902 }
 0x81d   :  { %1789 = vmatmul.mubr.f32.vlgmr.msra.gmra.mxu0 %v3832_v54  ;;  %2531 = vmatmul.mubr.f32.vlgmr.msra.gmra.mxu1 %v3832_v54 }
 0x81e   :  { %2565 = vmatprep.mubr.msk.f32.mxu0 %vm2865_vm4, %v3924_v24  ;;  %2534 = vmatpush3.msra.mxu0 %v1920_v29 }
 0x81f   :  { %2535 = vmatprep.subr.mxu0 %v3924_v24 }
 0x820   :  { %2536 = vmatpush3.msra.mxu0 %v1919_v59 }
 0x821   :  { %2537 = vmatprep.subr.mxu0 %v3924_v24 }
 0x822   :  { %2538 = vmatpush3.msra.mxu0 %v1918_v41  ;;  %v2058_v41 = vld [vmem:[#allocation11] ss:$0 sm:$0xff] }
 0x823   :  { %2539 = vmatprep.subr.mxu0 %v3924_v24 }
 0x824   :  { %2540 = vmatpush3.msra.mxu0 %v1917_v1 }
 0x825   :  { %2541 = vmatprep.subr.mxu0 %v3924_v24 }
 0x826   :  { %2542 = vmatpush3.msra.mxu0 %v1916_v42 }
 0x827   :  { %2543 = vmatprep.subr.mxu0 %v3924_v24 }
 0x828   :  { %2544 = vmatpush3.msra.mxu0 %v1915_v9 }
 0x829   :  { %2545 = vmatprep.subr.mxu0 %v3924_v24 }
 0x82a   :  { %2546 = vmatpush3.msra.mxu0 %v1914_v10 }
 0x82b   :  { %2547 = vmatprep.subr.mxu0 %v3924_v24 }
 0x82c   :  { %2548 = vmatpush3.msra.mxu0 %v1913_v13 }
 0x82d   :  { %2549 = vmatprep.subr.mxu0 %v3924_v24 }
 0x82e   :  { %2550 = vmatpush3.msra.mxu0 %v1912_v39 }
 0x82f   :  { %2551 = vmatprep.subr.mxu0 %v3924_v24 }
 0x830   :  { %2552 = vmatpush3.msra.mxu0 %v1911_v46 }
 0x831   :  { %2553 = vmatprep.subr.mxu0 %v3924_v24 }
 0x832   :  { %2554 = vmatpush3.msra.mxu0 %v1910_v47 }
 0x833   :  { %2555 = vmatprep.subr.mxu0 %v3924_v24 }
 0x834   :  { %2556 = vmatpush3.msra.mxu0 %v1909_v48 }
 0x835   :  { %2557 = vmatprep.subr.mxu0 %v3924_v24 }
 0x836   :  { %2558 = vmatpush3.msra.mxu0 %v1908_v50 }
 0x837   :  { %2559 = vmatprep.subr.mxu0 %v3924_v24 }
 0x838   :  { %2560 = vmatpush3.msra.mxu0 %v1907_v51 }
 0x839   :  { %2561 = vmatprep.subr.mxu0 %v3924_v24 }
 0x83a   :  { %2562 = vmatpush3.msra.mxu0 %v1906_v52 }
 0x83b   :  { %2563 = vmatprep.subr.mxu0 %v3924_v24  ;;  %v1199_v24 = vpop.permute.xlu1 %1198 }
 0x83c   :  { %2564 = vmatpush3.msra.mxu0 %v1905_v53  ;;  %vm1200_vm7 = vcmp.eq.s32.totalorder %v1199_v24, 1 }
 0x83f   :  { %v1372_v27 = vpop.permute.xlu1 %1371 }
 0x840   :  { %vm1373_vm8 = vcmp.eq.s32.totalorder %v1372_v27, 1 }
 0x843   :  { %v1545_v21 = vpop.permute.xlu1 %1544 }
 0x844   :  { %vm1546_vm9 = vcmp.eq.s32.totalorder %v1545_v21, 1 }
 0x847   :  { %v1718_v14 = vpop.permute.xlu1 %1717 }
 0x848   :  { %vm1719_vm10 = vcmp.eq.s32.totalorder %v1718_v14, 1 }
 0x84b   :  { %v1891_v37 = vpop.permute.xlu1 %1890 }
 0x84c   :  { %vm1892_vm11 = vcmp.eq.s32.totalorder %v1891_v37, 1 }
 0x8dd   :  { %v1790_v55 = vpop.f32.mrf.mxu0  ;;  %v1861_v43 = vpop.f32.mrf.mxu1 }
 0x8de   :  { %v1865_v57 = vadd.f32 %v1790_v55, %v3965_v56  ;;  %v1879_v22 = vadd.f32 %v3827_v26, %v1861_v43  ;;  %v1028_v26 = vsel %vm1027_vm6, %v3970_v32, %v855_v33 }
 0x8df   :  { %v2532_v58 = vpop.f32.mrf.mxu1  ;;  %v1792_v0 = vpop.f32.mrf.mxu0  ;;  %v1201_v40 = vsel %vm1200_vm7, %v3971_v28, %v1028_v26 }
 0x8e0   :  { %v2056_v61 = vmul.f32 -1.442695, %v1865_v57  ;;  %v1872_v45 = vadd.f32 %v1792_v0, %v3966_v7  ;;  %v1374_v38 = vsel %vm1373_vm8, %v3647_v8, %v1201_v40 }
 0x8e1   :  { %v1547_v44 = vsel %vm1546_vm9, %v3755_v5, %v1374_v38 }
 0x8e2   :  { %2660 = vpow2.f32 %v2056_v61  ;;  %v2057_v60 = vmul.f32 -1.442695, %v1872_v45  ;;  %v1720_v49 = vsel %vm1719_vm10, %v3832_v54, %v1547_v44 }
 0x8e4   :  { %2662 = vpow2.f32 %v2057_v60 }
 0x8ef   :  { %v2661_v63 = vpop.eup %2660 }
 0x8f0   :  { %v1869_v2 = vadd.f32 1.0, %v2661_v63 }
 0x8f1   :  { %v2663_v4 = vpop.eup %2662 }
 0x8f2   :  { %2664 = vrcp.f32 %v1869_v2  ;;  %v1876_v17 = vadd.f32 1.0, %v2663_v4 }
 0x8f4   :  { %2666 = vrcp.f32 %v1876_v17 }
 0x8ff   :  { %v2665_v31 = vpop.eup %2664 }
 0x900   :  { %v1880_v11 = vmul.f32 %v2665_v31, %v1879_v22 }
 0x901   :  { %v2667_v35 = vpop.eup %2666 }
 0x902   :  { %v1881_v15 = vadd.f32 %v3967_v12, %v1880_v11  ;;  %v1883_v25 = vsub.f32 1.0, %v2667_v35  ;;  %v1885_v36 = vmul.f32 %v2667_v35, %v3832_v54 }
 0x904   :  { %2668 = vtanh.f32 %v1881_v15 }
 0x911   :  { %v2669_v34 = vpop.eup %2668 }
 0x912   :  { %v1884_v19 = vmul.f32 %v2669_v34, %v1883_v25 }
 0x914   :  { %v1886_v6 = vadd.f32 %v1885_v36, %v1884_v19 }
 0x916   :  { %v1893_v29 = vsel %vm1892_vm11, %v1886_v6, %v1720_v49 }
 0x917   :  { %v1904_v59 = vmul.f32 %v1903_v23, %v1893_v29 }
 0x919   :  { %2566 = vmatmul.mubr.f32.vlgmr.msra.gmra.mxu0 %v1904_v59 }
 0x9d9   :  { %v1994_v1 = vpop.f32.mrf.mxu0 }
 0x9da   :  { %v1995_v42 = vadd.f32 %v2058_v41, %v1994_v1 }
 0x9db   :  { %v2567_v9 = vpop.f32.mrf.mxu0 }
 0x9dc   :  { %v1998_v10 = vmax.f32 %v1995_v42, 0.0 }
 0x9de   :  { %1999 = vst [vmem:[#allocation12] sm:$0xff] %v1998_v10 }
 0x9df   :  { %2830 = shalt.err (!%p2827_p1)
}
 0x9e0   :  { %2009 = dma.vmem_to_hbm [thread:$0]  %s2007_s20, 128, %s3876_s8, [#allocation5]  }
 0x9e1   :  { %2845 = dma.done.wait [#allocation5], 128  }
 0x9e2   :  { %2846 = vsyncadd [#allocation5], 4294967168 }
 0x9e3   :  { %2013 = vsyncpa [#allocation4], 1 }
 0x9e4   :  { %2014 = vsyncpa [#allocation7], 1 }
 0x9e5   :  { %2015 = vsyncpa [#allocation10], 1 }
 0x9e6   :  { %2016 = vsyncpa [#allocation5], 1 }

</bundles_post_ra>
